<compile_context>
chip_gen: v6e
topology: v6e:2x2x1
jax: 0.10.0
libtpu: 0.0.40
codegen_flags: <defaults>
</compile_context>

<pallas_src>
import math
import functools

import numpy as np
import jax
import jax.numpy as jnp
from jax.experimental import pallas as pl
from jax.experimental.pallas import tpu as pltpu

# ----- module constants (match LogMelSpectrogram.__init__ defaults) -----
SAMPLE_RATE = 44100
N_FFT = 1024
WIN_LENGTH = N_FFT
HOP = 441
F_MIN = 30.0
F_MAX = 11000.0
N_MELS = 128
LOG_MULT = 1000.0             # log_multiplier
N_FREQS = N_FFT // 2 + 1      # 513 onesided bins
N_FREQ_KEEP = 256             # bins >= 256 (f > f_max=11kHz) have exactly-zero mel weights
N_TAIL = N_FFT - 2 * HOP      # 142: third chunk of a frame (1024 = 441 + 441 + 142)
assert 0 < N_TAIL <= HOP, "halo decomposition assumes 2*hop < n_fft <= 3*hop"


# ------------------------- deterministic parameters -------------------------
def _hz_to_mel_slaney(freq):
    f_sp = 200.0 / 3.0
    min_log_hz = 1000.0
    min_log_mel = min_log_hz / f_sp
    logstep = math.log(6.4) / 27.0
    if freq >= min_log_hz:
        return min_log_mel + math.log(freq / min_log_hz) / logstep
    return freq / f_sp


def _mel_to_hz_slaney(mels):
    f_sp = 200.0 / 3.0
    min_log_hz = 1000.0
    min_log_mel = min_log_hz / f_sp
    logstep = math.log(6.4) / 27.0
    lin = f_sp * mels
    logf = min_log_hz * np.exp(logstep * (mels - min_log_mel))
    return np.where(mels >= min_log_mel, logf, lin)


def _melscale_fbanks():
    # torchaudio.functional.melscale_fbanks, mel_scale='slaney', norm=None
    all_freqs = np.linspace(0.0, SAMPLE_RATE // 2, N_FREQS)
    m_min = _hz_to_mel_slaney(F_MIN)
    m_max = _hz_to_mel_slaney(F_MAX)
    m_pts = np.linspace(m_min, m_max, N_MELS + 2)
    f_pts = _mel_to_hz_slaney(m_pts)
    f_diff = f_pts[1:] - f_pts[:-1]                       # (n_mels+1,)
    slopes = f_pts[None, :] - all_freqs[:, None]          # (n_freqs, n_mels+2)
    down = (-1.0 * slopes[:, :-2]) / f_diff[:-1]
    up = slopes[:, 2:] / f_diff[1:]
    fb = np.maximum(0.0, np.minimum(down, up))            # (n_freqs, n_mels)
    return fb.astype(np.float32)


@functools.lru_cache(maxsize=1)
def _build_constants():
    # mel filterbank: truncation to N_FREQ_KEEP bins is exact (filters are zero
    # above f_max=11 kHz -> bin 255.4); log_multiplier folded in; bf16 so the
    # second matmul also runs at full bf16 MXU rate (f32 acc kept in-kernel).
    fb_full = _melscale_fbanks()                          # (513, 128) f32
    assert np.all(fb_full[N_FREQ_KEEP:, :] == 0.0), "freq truncation not exact"
    fb = fb_full[:N_FREQ_KEEP, :].astype(np.float64) * LOG_MULT

    # fused real-DFT matrix [cos | -sin] with periodic Hann window and the
    # 'frame_length' normalization (1/sqrt(win_length)) baked into the rows.
    n = np.arange(N_FFT)
    window = 0.5 - 0.5 * np.cos(2.0 * np.pi * n / N_FFT)  # periodic Hann
    inv_norm = 1.0 / math.sqrt(WIN_LENGTH)                # normalized='frame_length'
    k = np.arange(N_FREQ_KEEP)
    ang = 2.0 * np.pi * np.outer(n, k) / N_FFT            # (n_fft, 256)
    dft = np.concatenate([np.cos(ang), -np.sin(ang)], axis=1)   # (n_fft, 512)
    dft *= (window * inv_norm)[:, None]

    # split along the sample axis so frame r = [row r | row r+1 | row r+2[:142]]
    # maps to three matmuls against row-shifted views of the hop-length rows.
    d0 = jnp.asarray(dft[:HOP], jnp.bfloat16)             # (441, 512)
    d1 = jnp.asarray(dft[HOP:2 * HOP], jnp.bfloat16)      # (441, 512)
    d2 = jnp.asarray(dft[2 * HOP:], jnp.bfloat16)         # (142, 512)
    fb = jnp.asarray(fb, jnp.bfloat16)                    # (256, 128)
    return d0, d1, d2, fb


def _pick_tm(n_frames):
    # TM=256 fills the 256-wide MXU on v6e/v7x and amortizes per-grid-step
    # overhead (128 already saturates v5e's 128-wide MXUs, 256 is still fine
    # there).  For short clips shrink TM so the grid keeps >= 2 steps, letting
    # dimension_semantics=("parallel",) shard tiles across v7x's 2 TensorCores.
    for tm in (256, 128, 64, 32, 16, 8):
        if n_frames >= 2 * tm:
            return tm
    return 8


# ------------------------------- Pallas kernel -------------------------------
def logmel_kernel(x_ref, d0_ref, d1_ref, d2_ref, fb_ref, o_ref, *, tm):
    # x_ref: (1, tm+2, HOP) bf16 halo of hop-length waveform rows.
    # Frame r of this tile = [rows[r] | rows[r+1] | rows[r+2][:142]], so the
    # windowed DFT is three bf16 matmuls over row-shifted views (f32 acc).
    x = x_ref[0]                                                    # (tm+2, 441)
    z = jnp.dot(x[0:tm, :], d0_ref[...], preferred_element_type=jnp.float32)
    z = z + jnp.dot(x[1:tm + 1, :], d1_ref[...], preferred_element_type=jnp.float32)
    z = z + jnp.dot(x[2:tm + 2, :N_TAIL], d2_ref[...],
                    preferred_element_type=jnp.float32)             # (tm, 512) = [Re|Im]

    re = z[:, :N_FREQ_KEEP]
    im = z[:, N_FREQ_KEEP:]
    mag = jnp.sqrt(re * re + im * im)          # power=1 (magnitude) per module spec; EUP sqrt

    # mel filterbank (log_multiplier folded in) -- bf16 MXU matmul, f32 acc.
    mel = jnp.dot(mag.astype(jnp.bfloat16), fb_ref[...],
                  preferred_element_type=jnp.float32)
    o_ref[...] = jnp.log1p(mel)


def log_mel_spectrogram(x):
    """x: 1-D float32 waveform -> (n_frames, n_mels) float32 log-mel (== torch out)."""
    num_samples = x.shape[0]
    # torch.stft(center=True, pad_mode='reflect') needs > n_fft//2 samples.
    assert num_samples >= N_FFT // 2 + 1, "waveform too short for reflect padding"
    n_frames = 1 + num_samples // HOP
    tm = _pick_tm(n_frames)
    n_tiles = pl.cdiv(n_frames, tm)

    # --- host glue (one cheap pass over the raw audio, no gather, no frame blow-up)
    pad = N_FFT // 2
    xp = jnp.pad(x.astype(jnp.float32), (pad, pad), mode="reflect")
    n_rows = (n_tiles + 1) * tm                       # hop-length rows incl. halo + round-up
    xp = jnp.pad(xp, (0, n_rows * HOP - xp.shape[0])) # tail zero-pad folds in the TM round-up
    rows = xp.astype(jnp.bfloat16).reshape(n_rows, HOP)

    # per-tile halo: rows [t*tm, t*tm + tm + 2) -- only 2 rows duplicated per tile,
    # built from two slices + a concat (no gather / index constant).
    halo = jnp.concatenate(
        [rows[:n_tiles * tm].reshape(n_tiles, tm, HOP),
         rows[tm:(n_tiles + 1) * tm].reshape(n_tiles, tm, HOP)[:, :2, :]],
        axis=1)                                       # (n_tiles, tm+2, HOP) bf16

    d0, d1, d2, fb = _build_constants()

    out = pl.pallas_call(
        functools.partial(logmel_kernel, tm=tm),
        out_shape=jax.ShapeDtypeStruct((n_tiles * tm, N_MELS), jnp.float32),
        grid=(n_tiles,),
        in_specs=[
            pl.BlockSpec((1, tm + 2, HOP), lambda i: (i, 0, 0)),          # waveform halo (bf16)
            pl.BlockSpec((HOP, 2 * N_FREQ_KEEP), lambda i: (0, 0)),       # DFT rows 0..440
            pl.BlockSpec((HOP, 2 * N_FREQ_KEEP), lambda i: (0, 0)),       # DFT rows 441..881
            pl.BlockSpec((N_TAIL, 2 * N_FREQ_KEEP), lambda i: (0, 0)),    # DFT rows 882..1023
            pl.BlockSpec((N_FREQ_KEEP, N_MELS), lambda i: (0, 0)),        # mel fbank * log_mult
        ],
        out_specs=pl.BlockSpec((tm, N_MELS), lambda i: (i, 0)),
        compiler_params=pltpu.CompilerParams(
            dimension_semantics=("parallel",),   # tiles shard across v7x's 2 TensorCores
            vmem_limit_bytes=32 << 20,           # real need ~6 MiB; safe on v7x's 64 MiB
        ),
    )(halo, d0, d1, d2, fb)

    # TODO(synk): batched / multi-channel waveforms are handled by vmapping the wrapper;
    # a fused multi-channel grid axis would amortize the constant DMAs further.
    return out[:n_frames]


# --------------------------- pure-JAX f32 reference ---------------------------
def _reference_logmel(x):
    pad = N_FFT // 2
    xp = jnp.pad(x.astype(jnp.float32), (pad, pad), mode="reflect")
    n_frames = 1 + x.shape[0] // HOP
    idx = np.arange(n_frames)[:, None] * HOP + np.arange(N_FFT)[None, :]
    frames = xp[jnp.asarray(idx)]                                   # (n_frames, n_fft)
    n = np.arange(N_FFT)
    window = (0.5 - 0.5 * np.cos(2.0 * np.pi * n / N_FFT)) / math.sqrt(WIN_LENGTH)
    spec = jnp.fft.rfft(frames * jnp.asarray(window, jnp.float32), axis=-1)
    mel = jnp.abs(spec) @ jnp.asarray(_melscale_fbanks())           # power=1
    return jnp.log1p(LOG_MULT * mel)


if __name__ == "__main__":
    key = jax.random.PRNGKey(0)
    # 0.1 s of 44.1 kHz audio -> 11 frames of 128 mel bins
    x = jax.random.normal(key, (4410,), dtype=jnp.float32)

    y = log_mel_spectrogram(x)
    jax.block_until_ready(y)

    n_frames = 1 + x.shape[0] // HOP
    assert y.shape == (n_frames, N_MELS), y.shape
    assert y.dtype == jnp.float32
    assert bool(jnp.all(jnp.isfinite(y)))

    # bf16-MXU kernel vs f32 rfft reference: expect ~1e-2 agreement in the log domain.
    ref = _reference_logmel(x)
    err = float(jnp.max(jnp.abs(y - ref)))
    assert err < 0.15, f"max |err| vs f32 reference = {err}"

    print("KERNEL_OK")
</pallas_src>

<mosaic_0001>
module attributes {stable_mosaic.version = 11 : i64} {
  func.func @logmel_kernel(%arg0: i32, %arg1: memref<1x10x441xbf16, #tpu.memory_space<vmem>>, %arg2: memref<441x512xbf16, #tpu.memory_space<vmem>>, %arg3: memref<441x512xbf16, #tpu.memory_space<vmem>>, %arg4: memref<142x512xbf16, #tpu.memory_space<vmem>>, %arg5: memref<256x128xbf16, #tpu.memory_space<vmem>>, %arg6: memref<8x128xf32, #tpu.memory_space<vmem>>) attributes {dimension_semantics = [#tpu.dimension_semantics<parallel>], iteration_bounds = array<i64: 2>, scalar_prefetch = 0 : i64, scratch_operands = 0 : i64, tpu.core_type = #tpu.core_type<tc>, window_params = [{transform_indices = @transform_0, window_bounds = array<i64: 1, 10, 441>}, {pipeline_mode = #tpu.pipeline_mode<synchronous>, transform_indices = @transform_1, window_bounds = array<i64: 441, 512>}, {pipeline_mode = #tpu.pipeline_mode<synchronous>, transform_indices = @transform_2, window_bounds = array<i64: 441, 512>}, {pipeline_mode = #tpu.pipeline_mode<synchronous>, transform_indices = @transform_3, window_bounds = array<i64: 142, 512>}, {pipeline_mode = #tpu.pipeline_mode<synchronous>, transform_indices = @transform_4, window_bounds = array<i64: 256, 128>}, {transform_indices = @transform_5, window_bounds = array<i64: 8, 128>}]} {
    %c0 = arith.constant 0 : index
    %c0_0 = arith.constant 0 : index
    %c0_1 = arith.constant 0 : index
    %0 = vector.load %arg1[%c0, %c0_0, %c0_1] : memref<1x10x441xbf16, #tpu.memory_space<vmem>>, vector<1x10x441xbf16>
    %1 = vector.shape_cast %0 : vector<1x10x441xbf16> to vector<10x441xbf16>
    %2 = vector.extract_strided_slice %1 {offsets = [0, 0], sizes = [8, 441], strides = [1, 1]} : vector<10x441xbf16> to vector<8x441xbf16>
    %c0_2 = arith.constant 0 : index
    %c0_3 = arith.constant 0 : index
    %3 = vector.load %arg2[%c0_2, %c0_3] : memref<441x512xbf16, #tpu.memory_space<vmem>>, vector<441x512xbf16>
    %cst = arith.constant dense<0.000000e+00> : vector<8x512xf32>
    %4 = tpu.matmul %2, %3, %cst {dimension_numbers = #tpu.dot_dimension_numbers<[1], [0], [0], [1], [0, 0, 1, 1], [], []>} : vector<8x441xbf16>, vector<441x512xbf16>, vector<8x512xf32> -> vector<8x512xf32>
    %5 = vector.extract_strided_slice %1 {offsets = [1, 0], sizes = [8, 441], strides = [1, 1]} : vector<10x441xbf16> to vector<8x441xbf16>
    %c0_4 = arith.constant 0 : index
    %c0_5 = arith.constant 0 : index
    %6 = vector.load %arg3[%c0_4, %c0_5] : memref<441x512xbf16, #tpu.memory_space<vmem>>, vector<441x512xbf16>
    %cst_6 = arith.constant dense<0.000000e+00> : vector<8x512xf32>
    %7 = tpu.matmul %5, %6, %cst_6 {dimension_numbers = #tpu.dot_dimension_numbers<[1], [0], [0], [1], [0, 0, 1, 1], [], []>} : vector<8x441xbf16>, vector<441x512xbf16>, vector<8x512xf32> -> vector<8x512xf32>
    %8 = arith.addf %4, %7 : vector<8x512xf32>
    %9 = vector.extract_strided_slice %1 {offsets = [2, 0], sizes = [8, 142], strides = [1, 1]} : vector<10x441xbf16> to vector<8x142xbf16>
    %c0_7 = arith.constant 0 : index
    %c0_8 = arith.constant 0 : index
    %10 = vector.load %arg4[%c0_7, %c0_8] : memref<142x512xbf16, #tpu.memory_space<vmem>>, vector<142x512xbf16>
    %cst_9 = arith.constant dense<0.000000e+00> : vector<8x512xf32>
    %11 = tpu.matmul %9, %10, %cst_9 {dimension_numbers = #tpu.dot_dimension_numbers<[1], [0], [0], [1], [0, 0, 1, 1], [], []>} : vector<8x142xbf16>, vector<142x512xbf16>, vector<8x512xf32> -> vector<8x512xf32>
    %12 = arith.addf %8, %11 : vector<8x512xf32>
    %13 = vector.extract_strided_slice %12 {offsets = [0, 0], sizes = [8, 256], strides = [1, 1]} : vector<8x512xf32> to vector<8x256xf32>
    %14 = vector.extract_strided_slice %12 {offsets = [0, 256], sizes = [8, 256], strides = [1, 1]} : vector<8x512xf32> to vector<8x256xf32>
    %15 = arith.mulf %13, %13 : vector<8x256xf32>
    %16 = arith.mulf %14, %14 : vector<8x256xf32>
    %17 = arith.addf %15, %16 : vector<8x256xf32>
    %18 = math.sqrt %17 : vector<8x256xf32>
    %19 = arith.truncf %18 : vector<8x256xf32> to vector<8x256xbf16>
    %c0_10 = arith.constant 0 : index
    %c0_11 = arith.constant 0 : index
    %20 = vector.load %arg5[%c0_10, %c0_11] : memref<256x128xbf16, #tpu.memory_space<vmem>>, vector<256x128xbf16>
    %cst_12 = arith.constant dense<0.000000e+00> : vector<8x128xf32>
    %21 = tpu.matmul %19, %20, %cst_12 {dimension_numbers = #tpu.dot_dimension_numbers<[1], [0], [0], [1], [0, 0, 1, 1], [], []>} : vector<8x256xbf16>, vector<256x128xbf16>, vector<8x128xf32> -> vector<8x128xf32>
    %22 = math.log1p %21 : vector<8x128xf32>
    %c0_13 = arith.constant 0 : index
    %c0_14 = arith.constant 0 : index
    %23 = vector.load %arg6[%c0_13, %c0_14] : memref<8x128xf32, #tpu.memory_space<vmem>>, vector<8x128xf32>
    tpu.vector_store %arg6[%c0_13, %c0_14], %22 {strides = array<i32>} : memref<8x128xf32, #tpu.memory_space<vmem>>, vector<8x128xf32>,
    return
  }
  func.func @transform_0(%arg0: i32) -> (i32, i32, i32) {
    %c0_i32 = arith.constant 0 : i32
    %c0_i32_0 = arith.constant 0 : i32
    %c0_i32_1 = arith.constant 0 : i32
    return %arg0, %c0_i32, %c0_i32_0 : i32, i32, i32
  }
  func.func @transform_1(%arg0: i32) -> (i32, i32) {
    %c0_i32 = arith.constant 0 : i32
    %c0_i32_0 = arith.constant 0 : i32
    %c0_i32_1 = arith.constant 0 : i32
    return %c0_i32, %c0_i32_0 : i32, i32
  }
  func.func @transform_2(%arg0: i32) -> (i32, i32) {
    %c0_i32 = arith.constant 0 : i32
    %c0_i32_0 = arith.constant 0 : i32
    %c0_i32_1 = arith.constant 0 : i32
    return %c0_i32, %c0_i32_0 : i32, i32
  }
  func.func @transform_3(%arg0: i32) -> (i32, i32) {
    %c0_i32 = arith.constant 0 : i32
    %c0_i32_0 = arith.constant 0 : i32
    %c0_i32_1 = arith.constant 0 : i32
    return %c0_i32, %c0_i32_0 : i32, i32
  }
  func.func @transform_4(%arg0: i32) -> (i32, i32) {
    %c0_i32 = arith.constant 0 : i32
    %c0_i32_0 = arith.constant 0 : i32
    %c0_i32_1 = arith.constant 0 : i32
    return %c0_i32, %c0_i32_0 : i32, i32
  }
  func.func @transform_5(%arg0: i32) -> (i32, i32) {
    %c0_i32 = arith.constant 0 : i32
    %c0_i32_0 = arith.constant 0 : i32
    return %arg0, %c0_i32 : i32, i32
  }
}

</mosaic_0001>

<bundles_post_ra>
// kernel: tpu_custom_call.1
= control target key start
LH: loop header
LB: loop body
LE: loop exit
PB: predicated region body
PF: predicated region fallthrough
CT: control target
= control target key end

     0   :  { %10 = vsyncpa [#allocation3], 0  ;;  %s3957_s0 = inlined_call_operand.vmem [shape: bf16[2,10,441], index: 0, kind: input, shape index: {}]   ;;  %s3958_s1 = inlined_call_operand.hbm [shape: bf16[441,512], index: 1, kind: input, shape index: {}]   ;;  %s3959_s2 = inlined_call_operand.hbm [shape: bf16[441,512], index: 2, kind: input, shape index: {}]   ;;  %s3960_s3 = inlined_call_operand.hbm [shape: bf16[142,512], index: 3, kind: input, shape index: {}]   ;;  %s3961_s4 = inlined_call_operand.hbm [shape: bf16[256,128], index: 4, kind: input, shape index: {}]   ;;  %s3962_s5 = inlined_call_operand.hbm [shape: f32[16,128], index: 5, kind: output, shape index: {}]  }
   0x1   :  { %11 = vsyncpa [#allocation6], 0 }
   0x2   :  { %12 = vsyncpa [#allocation9], 0 }
   0x3   :  { %13 = vsyncpa [#allocation4], 0 }
   0x4   :  { %15 = vsyncpa [#allocation4 + $0x1], 0  ;;  %s3729_s18 = smov 0   ;;  %s3731_s19 = smov 0  }
   0x5   :  { %s3733_s20 = smov 0   ;;  %s3735_s21 = smov 0  }
   0x6 LB: > { %s3750_s22 = sadd.s32 4294967295, %s3687_s21   ;;  %s2672_s23 = sadd.s32 4294967294, %s3687_s21   ;;  %s3687_s21 = sphi %s3735_s21, %s3980_s21   ;;  %s3683_s20 = sphi %s3733_s20, %s3979_s20   ;;  %s3679_s19 = sphi %s3731_s19, %s3978_s19   ;;  %s3675_s18 = sphi %s3729_s18, %s3977_s18  }
   0x7   : > { %s3754_s24 = sadd.s32 1, %s3687_s21   ;;  %s138_s25 = sadd.s32 1, %s3683_s20 }
   0x8   : > { %s135_s26 = ssub.s32 %s3687_s21, %s3754_s24  ;;  %p148_p0 = scmp.ne.s32.totalorder %s3683_s20, %s3679_s19 }
   0x9   : > { %p136_p1 = scmp.eq.s32.totalorder %s135_s26, 0  ;;  %p149_p2 = scmp.eq.s32.totalorder %s3750_s22, 1 }
   0xa   : > { %p154_p3 = scmp.ne.s32.totalorder %s3679_s19, %s3675_s18  ;;  %p155_p4 = scmp.eq.s32.totalorder %s2672_s23, 1 }
   0xb   : > { %s3765_s27 = scalar_select %p136_p1, %s3683_s20, %s138_s25  }
   0xc   : > { %p3767_p5 = por %p149_p2, %p148_p0  ;;  %p3771_p6 = por %p155_p4, %p154_p3 }
   0xd   : > { %p2673_p7 = scmp.ge.s32.totalorder %s3687_s21, 1  ;;  %p162_p8 = scmp.lt.s32.totalorder %s3687_s21, 3 }
   0xe   : > { %s3965_s28 = scalar_select %p3767_p5, 1, 0 }
   0xf   : > { %s3966_s29 = scalar_select %p3771_p6, 1, 0 }
  0x10   : > { %p3963_p9 = scmp.eq.s32.totalorder %s3750_s22, 0  ;;  %p3778_p10 = pnand %p2673_p7, %p162_p8 }
  0x11   : > { %s3689_s6 = smov [#allocation5]   ;;  %s3690_s9 = smov [#allocation2]  }
  0x12   : > { %p3024_p11 = pneg %p3778_p10  ;;  %s187_s7 = sshll.u32 %s3689_s6, 4  ;;  %s188_s7 = int_to_ptr.vmem [resolvable:$true] %s187_s7 }
  0x13   : > { %s174_s10 = sshll.u32 %s3690_s9, 4  ;;  %s3691_s11 = smov [#allocation7]   ;;  %s175_s10 = int_to_ptr.vmem [resolvable:$true] %s174_s10 }
  0x14   : > { %p3786_p12 = pnand %p3963_p9, %p3024_p11  ;;  %s200_s12 = sshll.u32 %s3691_s11, 4  ;;  %s201_s12 = int_to_ptr.vmem [resolvable:$true] %s200_s12 }
  0x15   : > { %s3522_s13 = scalar_lea.vmem %s188_s7, 14336  ;;  %p3530_p3 = scmp.lt.s32.totalorder %s188_s7, %s188_s7 }
  0x16   : > { %p3513_p13 = pneg %p3786_p12  ;;  %p3523_p0 = scmp.ne.s32.totalorder %s188_s7, %s3522_s13 }
  0x17   : > { %p3531_p4 = scmp.lt.s32.totalorder %s3522_s13, %s3522_s13 }
  0x18   : > { %p3525_p1 = pnand %p3523_p0, %p3513_p13 }
  0x19   : > { %p3532_p7 = por %p3531_p4, %p3530_p3 }
  0x1a   : > { %p3526_p2 = pneg %p3525_p1 }
  0x1c   : > { %p3533_p8 = pnand %p3532_p7, %p3526_p2 }
  0x1e   : > { %3536 = shalt.err (!%p3533_p8)
}
  0x1f   : > { %s3692_s14 = smov 256   ;;  %s3693_s15 = smov 16  }
  0x20   : > { %3030 = dma.hbm_to_vmem [thread:$0]  (!%p3786_p12), %s3959_s2, 14336, %s188_s7, [#allocation6], %s3692_s14, %s3692_s14, %s3693_s15  }
  0x21   : > { %s3548_s23 = scalar_lea.vmem %s175_s10, 14336  ;;  %p3556_p9 = scmp.lt.s32.totalorder %s175_s10, %s175_s10 }
  0x22   : > { %p3549_p11 = scmp.ne.s32.totalorder %s175_s10, %s3548_s23  ;;  %p3557_p6 = scmp.lt.s32.totalorder %s3548_s23, %s3548_s23 }
  0x24   : > { %p3551_p0 = pnand %p3549_p11, %p3513_p13  ;;  %p3558_p3 = por %p3557_p6, %p3556_p9 }
  0x26   : > { %p3552_p1 = pneg %p3551_p0 }
  0x28   : > { %p3559_p2 = pnand %p3558_p3, %p3552_p1 }
  0x2a   : > { %3562 = shalt.err (!%p3559_p2)
}
  0x2b   : > { %3027 = dma.hbm_to_vmem [thread:$0]  (!%p3786_p12), %s3958_s1, 14336, %s175_s10, [#allocation3], %s3692_s14, %s3692_s14, %s3693_s15  }
  0x2c   : > { %s3574_s6 = scalar_lea.vmem %s201_s12, 4608  ;;  %p3582_p11 = scmp.lt.s32.totalorder %s201_s12, %s201_s12 }
  0x2d   : > { %p3575_p4 = scmp.ne.s32.totalorder %s201_s12, %s3574_s6  ;;  %p3583_p0 = scmp.lt.s32.totalorder %s3574_s6, %s3574_s6 }
  0x2f   : > { %p3577_p7 = pnand %p3575_p4, %p3513_p13  ;;  %p3584_p5 = por %p3583_p0, %p3582_p11 }
  0x31   : > { %p3578_p8 = pneg %p3577_p7 }
  0x33   : > { %p3585_p6 = pnand %p3584_p5, %p3578_p8 }
  0x35   : > { %3588 = shalt.err (!%p3585_p6)
}
  0x36   : > { %3033 = dma.hbm_to_vmem [thread:$0]  (!%p3786_p12), %s3960_s3, 4608, %s201_s12, [#allocation6], %s3692_s14, %s3692_s14, %s3693_s15  }
  0x37   : > { %s3694_s10 = smov [#allocation8]  }
  0x38   : > { %s213_s11 = sshll.u32 %s3694_s10, 4  ;;  %s214_s11 = int_to_ptr.vmem [resolvable:$true] %s213_s11 }
  0x39   : > { %s3600_s13 = scalar_lea.vmem %s214_s11, 2048  ;;  %p3608_p2 = scmp.lt.s32.totalorder %s214_s11, %s214_s11 }
  0x3a   : > { %p3601_p9 = scmp.ne.s32.totalorder %s214_s11, %s3600_s13  ;;  %p3609_p4 = scmp.lt.s32.totalorder %s3600_s13, %s3600_s13 }
  0x3c   : > { %p3603_p1 = pnand %p3601_p9, %p3513_p13  ;;  %p3610_p5 = por %p3609_p4, %p3608_p2 }
  0x3e   : > { %p3604_p3 = pneg %p3603_p1 }
  0x40   : > { %p3611_p7 = pnand %p3610_p5, %p3604_p3 }
  0x42   : > { %3614 = shalt.err (!%p3611_p7)
}
  0x43   : > { %s3695_s16 = smov 64   ;;  %s3696_s17 = smov 4  }
  0x44   : > { %3036 = dma.hbm_to_vmem [thread:$0]  (!%p3786_p12), %s3961_s4, 2048, %s214_s11, [#allocation9], %s3695_s16, %s3695_s16, %s3696_s17  }
  0x45   : > { %237 = sbr.rel (%p3778_p10) target bundleno = 795 (0x31b), region = 40  ;;  %p3969_p8 = scmp.eq.s32.totalorder (!%p3778_p10), %s3750_s22, 0 }
  0x4a   : > { %3658 = dma.done.wait (%p3969_p8), [#allocation3], 14336   ;;  %p3970_p13 = pmov %p3969_p8 }
  0x4b   : > { %p3971_p11 = pmov %p3969_p8 }
  0x4c   : > { %3660 = vsyncadd (%p3970_p13), [#allocation3], 4294952960 }
  0x4d   : > { %3662 = dma.done.wait (%p3971_p11), [#allocation6], 18944   ;;  %p3972_p0 = pmov %p3969_p8 }
  0x4f   : > { %3664 = vsyncadd (%p3972_p0), [#allocation6], 4294948352  ;;  %p3973_p6 = pmov %p3972_p0 }
  0x50   : > { %p3974_p12 = pmov %p3972_p0 }
  0x51   : > { %3666 = dma.done.wait (%p3973_p6), [#allocation9], 2048  }
  0x52   : > { %3668 = vsyncadd (%p3974_p12), [#allocation9], 4294965248  ;;  %v3091_v0 = vld [vmem:[#allocation5 + $0xe4] ss:$16 sps:$4 sm:$0xff]   ;;  %v3095_v2 = vld [vmem:[#allocation5 + $0xe0] ss:$16 sps:$4 sm:$0xff]  }
  0x53   : > { %v3093_v1 = vld [vmem:[#allocation5 + $0x2e4] ss:$16 sps:$4 sm:$0xff]   ;;  %1134 = vmatprep.subr.bf16.mxu0 %v3091_v0  ;;  %v3096_v3 = vld [vmem:[#allocation5 + $0x2e0] ss:$16 sps:$4 sm:$0xff]   ;;  %p277_p10 = scmp.lt.s32.totalorder %s3750_s22, 1  ;;  %vm1118_vm0 = vcmask 1043456  }
  0x54   : > { %1175 = vmatprep.subr.bf16.mxu1 %v3093_v1  ;;  %v3097_v4 = vld [vmem:[#allocation5 + $0xc4] ss:$16 sps:$4 sm:$0xff]   ;;  %1135 = vmatpush1.bf16.msra.mxu0 %v3095_v2  ;;  %v3101_v6 = vld [vmem:[#allocation5 + $0xc0] ss:$16 sps:$4 sm:$0xff]   ;;  %vm1119_vm1 = vcmask 1044480   ;;  %v3697_v28 = vmov 65535  }
  0x55   : > { %1176 = vmatpush1.bf16.msra.mxu1 %v3096_v3  ;;  %v3099_v5 = vld [vmem:[#allocation5 + $0x2c4] ss:$16 sps:$4 sm:$0xff]   ;;  %1136 = vmatprep.subr.bf16.mxu0 %v3097_v4  ;;  %v3102_v7 = vld [vmem:[#allocation5 + $0x2c0] ss:$16 sps:$4 sm:$0xff]   ;;  %s278_s30 = scalar_select %p277_p10, %s3750_s22, 1  ;;  %v1120_v29 = vsel %vm1118_vm0, 4294967295, %v3697_v28 }
  0x56   : > { %1177 = vmatprep.subr.bf16.mxu1 %v3099_v5  ;;  %v3103_v8 = vld [vmem:[#allocation5 + $0xa4] ss:$16 sps:$4 sm:$0xff]   ;;  %v3107_v10 = vld [vmem:[#allocation5 + $0xa0] ss:$16 sps:$4 sm:$0xff]   ;;  %v3840_v33 = vsel %vm1119_vm1, %v1120_v29, 0  ;;  %vm1114_vm2 = vcmask 465920  }
  0x57   : > { %v3105_v9 = vld [vmem:[#allocation5 + $0x2a4] ss:$16 sps:$4 sm:$0xff]   ;;  %v3108_v11 = vld [vmem:[#allocation5 + $0x2a0] ss:$16 sps:$4 sm:$0xff]   ;;  %s2983_s8 = sshll.u32 %s278_s30, 5  ;;  %vm2255_vm3 = vcmask 113664  }
  0x58   : > { %1137 = vmatpush1.bf16.msra.mxu0 %v3101_v6  ;;  %v3109_v12 = vld [vmem:[#allocation5 + $0x84] ss:$16 sps:$4 sm:$0xff]   ;;  %v3113_v14 = vld [vmem:[#allocation5 + $0x80] ss:$16 sps:$4 sm:$0xff]   ;;  %s3846_s25 = scalar_lea.vmem %s3957_s0, %s2983_s8  ;;  %v3169_v3 = vld [vmem:[#allocation5 + $0xec] ss:$16 sps:$4 sm:$0xff]  }
  0x59   : > { %1178 = vmatpush1.bf16.msra.mxu1 %v3102_v7  ;;  %1138 = vmatprep.subr.bf16.mxu0 %v3103_v8  ;;  %v3111_v13 = vld [vmem:[#allocation5 + $0x284] ss:$16 sps:$4 sm:$0xff]   ;;  %v3114_v15 = vld [vmem:[#allocation5 + $0x280] ss:$16 sps:$4 sm:$0xff]   ;;  %v3850_v42 = vld [vmem:[%s3846_s25 + $0x8] sm:$0xff]  ;;  %vm2259_vm4 = vcmask 1046528  }
  0x5a   : > { %1179 = vmatprep.subr.bf16.mxu1 %v3105_v9  ;;  %v3115_v16 = vld [vmem:[#allocation5 + $0x64] ss:$16 sps:$4 sm:$0xff]   ;;  %v3119_v18 = vld [vmem:[#allocation5 + $0x60] ss:$16 sps:$4 sm:$0xff]   ;;  %v286_v43 = vld [vmem:[%s3846_s25 + $0x18] sm:$0x11] }
  0x5b   : > { %v3117_v17 = vld [vmem:[#allocation5 + $0x264] ss:$16 sps:$4 sm:$0xff]   ;;  %v3120_v19 = vld [vmem:[#allocation5 + $0x260] ss:$16 sps:$4 sm:$0xff]   ;;  %v2690_v45 = vcombine.high %v3850_v42, %v286_v43  ;;  %v2689_v48 = vcombine.low %v3850_v42, %v286_v43  ;;  %v3167_v6 = vld [vmem:[#allocation5 + $0xe8] ss:$16 sps:$4 sm:$0xff]  }
  0x5c   : > { %1139 = vmatpush1.bf16.msra.mxu0 %v3107_v10  ;;  %v3121_v20 = vld [vmem:[#allocation5 + $0x44] ss:$16 sps:$4 sm:$0xff]   ;;  %v3125_v22 = vld [vmem:[#allocation5 + $0x40] ss:$16 sps:$4 sm:$0xff]   ;;  %v3193_v28 = vld [vmem:[#allocation5 + $0x6c] ss:$16 sps:$4 sm:$0xff]  }
  0x5d   : > { %1180 = vmatpush1.bf16.msra.mxu1 %v3108_v11  ;;  %1140 = vmatprep.subr.bf16.mxu0 %v3109_v12  ;;  %v3123_v21 = vld [vmem:[#allocation5 + $0x244] ss:$16 sps:$4 sm:$0xff]   ;;  %v3126_v23 = vld [vmem:[#allocation5 + $0x240] ss:$16 sps:$4 sm:$0xff]   ;;  %v549_v49 = vshrl.u32 %v2690_v45, 16  ;;  %v551_v50 = vshll.u32 %v2690_v45, 16 }
  0x5e   : > { %1181 = vmatprep.subr.bf16.mxu1 %v3111_v13  ;;  %v3127_v24 = vld [vmem:[#allocation5 + $0x24] ss:$16 sps:$4 sm:$0xff]   ;;  %v3131_v26 = vld [vmem:[#allocation5 + $0x20] ss:$16 sps:$4 sm:$0xff]   ;;  %v544_v56 = vshll.u32 %v2689_v48, 16  ;;  %v542_v62 = vshrl.u32 %v2689_v48, 16 }
  0x5f   : > { %v3129_v25 = vld [vmem:[#allocation5 + $0x224] ss:$16 sps:$4 sm:$0xff]   ;;  %v3132_v27 = vld [vmem:[#allocation5 + $0x220] ss:$16 sps:$4 sm:$0xff]   ;;  %v553_v53 = vrot.slane %v551_v50, 1  ;;  %s274_s26 = sand.u32 1, %s3679_s19  }
  0x60   : > { %1141 = vmatpush1.bf16.msra.mxu0 %v3113_v14  ;;  %v3133_v30 = vld [vmem:[#allocation5 + $0x4] ss:$16 sps:$4 sm:$0xff]   ;;  %v3137_v34 = vld [vmem:[#allocation5] ss:$16 sps:$4 sm:$0xff]   ;;  %v546_v63 = vrot.slane %v544_v56, 1  ;;  %s2684_s6 = sshll.u32 %s274_s26, 3 }
  0x61   : > { %1182 = vmatpush1.bf16.msra.mxu1 %v3114_v15  ;;  %1142 = vmatprep.subr.bf16.mxu0 %v3115_v16  ;;  %v3135_v31 = vld [vmem:[#allocation5 + $0x204] ss:$16 sps:$4 sm:$0xff]   ;;  %v3138_v35 = vld [vmem:[#allocation5 + $0x200] ss:$16 sps:$4 sm:$0xff]   ;;  %v3855_v55 = vor.u32 %v553_v53, %v549_v49  ;;  %v3175_v11 = vld [vmem:[#allocation5 + $0xcc] ss:$16 sps:$4 sm:$0xff]  }
  0x62   : > { %1183 = vmatprep.subr.bf16.mxu1 %v3117_v17  ;;  %v3141_v32 = vld [vmem:[#allocation5 + $0x364] ss:$16 sps:$4 sm:$0x1f]   ;;  %v3144_v36 = vld [vmem:[#allocation5 + $0x360] ss:$16 sps:$4 sm:$0x1f]   ;;  %v3866_v5 = vor.u32 %v546_v63, %v542_v62 }
  0x63   : > { %v3139_v37 = vld [vmem:[#allocation5 + $0x1e4] ss:$16 sps:$4 sm:$0xff]   ;;  %v1126_v38 = vand.u32 %v3141_v32, %v3840_v33  ;;  %v3143_v39 = vld [vmem:[#allocation5 + $0x1e0] ss:$16 sps:$4 sm:$0xff]   ;;  %v1123_v41 = vand.u32 %v3144_v36, %v3840_v33  ;;  %2803 = vmatprep.mubr.msk.bf16.mxu1 %vm1114_vm2, %v3855_v55  ;;  %v3173_v13 = vld [vmem:[#allocation5 + $0xc8] ss:$16 sps:$4 sm:$0xff]  }
  0x64   : > { %1143 = vmatpush1.bf16.msra.mxu0 %v3119_v18  ;;  %v3145_v40 = vld [vmem:[#allocation5 + $0x1c4] ss:$16 sps:$4 sm:$0xff]   ;;  %v3149_v46 = vld [vmem:[#allocation5 + $0x1c0] ss:$16 sps:$4 sm:$0xff]   ;;  %v3181_v18 = vld [vmem:[#allocation5 + $0xac] ss:$16 sps:$4 sm:$0xff]  }
  0x65   : > { %1184 = vmatpush1.bf16.msra.mxu1 %v3120_v19  ;;  %1144 = vmatprep.subr.bf16.mxu0 %v3121_v20  ;;  %v3147_v44 = vld [vmem:[#allocation5 + $0x344] ss:$16 sps:$4 sm:$0xff]   ;;  %v3150_v47 = vld [vmem:[#allocation5 + $0x340] ss:$16 sps:$4 sm:$0xff]   ;;  %v3179_v19 = vld [vmem:[#allocation5 + $0xa8] ss:$16 sps:$4 sm:$0xff]  }
  0x66   : > { %1185 = vmatprep.subr.bf16.mxu1 %v3123_v21  ;;  %v3151_v51 = vld [vmem:[#allocation5 + $0x1a4] ss:$16 sps:$4 sm:$0xff]   ;;  %v3155_v54 = vld [vmem:[#allocation5 + $0x1a0] ss:$16 sps:$4 sm:$0xff]   ;;  %v3196_v29 = vld [vmem:[#allocation5 + $0x2ec] ss:$16 sps:$4 sm:$0xff]  }
  0x67   : > { %v3153_v52 = vld [vmem:[#allocation5 + $0x324] ss:$16 sps:$4 sm:$0xff]   ;;  %v3156_v57 = vld [vmem:[#allocation5 + $0x320] ss:$16 sps:$4 sm:$0xff]   ;;  %v3194_v32 = vld [vmem:[#allocation5 + $0x2e8] ss:$16 sps:$4 sm:$0xff]  }
  0x68   : > { %1145 = vmatpush1.bf16.msra.mxu0 %v3125_v22  ;;  %v3157_v58 = vld [vmem:[#allocation5 + $0x184] ss:$16 sps:$4 sm:$0xff]   ;;  %v3161_v60 = vld [vmem:[#allocation5 + $0x180] ss:$16 sps:$4 sm:$0xff]   ;;  %v3197_v36 = vld [vmem:[#allocation5 + $0x48] ss:$16 sps:$4 sm:$0xff]  }
  0x69   : > { %1186 = vmatpush1.bf16.msra.mxu1 %v3126_v23  ;;  %1146 = vmatprep.subr.bf16.mxu0 %v3127_v24  ;;  %v3159_v59 = vld [vmem:[#allocation5 + $0x304] ss:$16 sps:$4 sm:$0xff]   ;;  %v3162_v61 = vld [vmem:[#allocation5 + $0x300] ss:$16 sps:$4 sm:$0xff]   ;;  %v3187_v23 = vld [vmem:[#allocation5 + $0x8c] ss:$16 sps:$4 sm:$0xff]  }
  0x6a   : > { %1187 = vmatprep.subr.bf16.mxu1 %v3129_v25  ;;  %v3860_v0 = vld [vmem:[%s3846_s25] sm:$0xff]  ;;  %v285_v1 = vld [vmem:[%s3846_s25 + $0x10] sm:$0x11]  ;;  %v3185_v24 = vld [vmem:[#allocation5 + $0x88] ss:$16 sps:$4 sm:$0xff]   ;;  %s2980_s7 = sshll.u32 %s3750_s22, 7 }
  0x6b   : > { %v3165_v2 = vld [vmem:[#allocation5 + $0x164] ss:$16 sps:$4 sm:$0xff]   ;;  %v3864_v4 = vcombine.high %v3860_v0, %v285_v1  ;;  %v3170_v7 = vld [vmem:[#allocation5 + $0x160] ss:$16 sps:$4 sm:$0xff]   ;;  %v3872_v15 = vcombine.low %v3860_v0, %v285_v1  ;;  %v3211_v43 = vld [vmem:[#allocation5 + $0xc] ss:$16 sps:$4 sm:$0xff]   ;;  %s3922_s16 = scalar_lea.hbm %s3962_s5, %s2980_s7 }
  0x6c   : > { %1147 = vmatpush1.bf16.msra.mxu0 %v3131_v26  ;;  %v3171_v10 = vld [vmem:[#allocation5 + $0x144] ss:$16 sps:$4 sm:$0xff]   ;;  %v3176_v14 = vld [vmem:[#allocation5 + $0x140] ss:$16 sps:$4 sm:$0xff]   ;;  %v3209_v45 = vld [vmem:[#allocation5 + $0x8] ss:$16 sps:$4 sm:$0xff]  }
  0x6d   : > { %1188 = vmatpush1.bf16.msra.mxu1 %v3132_v27  ;;  %1148 = vmatprep.subr.bf16.mxu0 %v3133_v30  ;;  %v535_v8 = vshrl.u32 %v3864_v4, 16  ;;  %v537_v9 = vshll.u32 %v3864_v4, 16  ;;  %v3177_v17 = vld [vmem:[#allocation5 + $0x124] ss:$16 sps:$4 sm:$0xff]   ;;  %v3182_v20 = vld [vmem:[#allocation5 + $0x120] ss:$16 sps:$4 sm:$0xff]  }
  0x6e   : > { %1189 = vmatprep.subr.bf16.mxu1 %v3135_v31  ;;  %v530_v21 = vshll.u32 %v3872_v15, 16  ;;  %v3183_v22 = vld [vmem:[#allocation5 + $0x104] ss:$16 sps:$4 sm:$0xff]   ;;  %v3188_v25 = vld [vmem:[#allocation5 + $0x100] ss:$16 sps:$4 sm:$0xff]   ;;  %v528_v26 = vshrl.u32 %v3872_v15, 16 }
  0x6f   : > { %v539_v12 = vrot.slane %v537_v9, 1  ;;  %v3191_v31 = vld [vmem:[#allocation5 + $0x68] ss:$16 sps:$4 sm:$0xff]   ;;  %v3220_v48 = vld [vmem:[#allocation5 + $0x26c] ss:$16 sps:$4 sm:$0xff]   ;;  %s276_s9 = scalar_lea.vmem [#allocation10], %s2684_s6 }
  0x70   : > { %1149 = vmatpush1.bf16.msra.mxu0 %v3137_v34  ;;  %v532_v27 = vrot.slane %v530_v21, 1  ;;  %v3199_v34 = vld [vmem:[#allocation5 + $0x4c] ss:$16 sps:$4 sm:$0xff]   ;;  %v3215_v49 = vld [vmem:[#allocation5 + $0x1e8] ss:$16 sps:$4 sm:$0xff]   ;;  %s2572_s10 = sshll.u32 %s276_s9, 4  ;;  %s2573_s10 = int_to_ptr.vmem [resolvable:$true] %s2572_s10 }
  0x71   : > { %1190 = vmatpush1.bf16.msra.mxu1 %v3138_v35  ;;  %1150 = vmatprep.subr.bf16.mxu0 %v3139_v37  ;;  %v540_v16 = vor.u32 %v539_v12, %v535_v8  ;;  %v3202_v35 = vld [vmem:[#allocation5 + $0x2cc] ss:$16 sps:$4 sm:$0xff]   ;;  %v3200_v37 = vld [vmem:[#allocation5 + $0x2c8] ss:$16 sps:$4 sm:$0xff]   ;;  %v3265_v21 = vld [vmem:[#allocation2 + $0xe4] ss:$16 sps:$4 sm:$0xff]  }
  0x72   : > { %1199 = vmatprep.subr.bf16.mxu1 %v1126_v38  ;;  %v3876_v30 = vor.u32 %v532_v27, %v528_v26  ;;  %v3205_v38 = vld [vmem:[#allocation5 + $0x2c] ss:$16 sps:$4 sm:$0xff]   ;;  %v3218_v50 = vld [vmem:[#allocation5 + $0x268] ss:$16 sps:$4 sm:$0xff]   ;;  %v3274_v26 = vld [vmem:[#allocation2 + $0x2c4] ss:$16 sps:$4 sm:$0xff]   ;;  %v3885_v27 = vcombine.high %v3850_v42, %v3850_v42 }
  0x73   : > { %1166 = vmatprep.mubr.bf16.mxu0 %v540_v16  ;;  %v3221_v53 = vld [vmem:[#allocation5 + $0x1c8] ss:$16 sps:$4 sm:$0xff]   ;;  %v3232_v56 = vld [vmem:[#allocation5 + $0x22c] ss:$16 sps:$4 sm:$0xff]   ;;  %s2559_s17 = scalar_lea.sflag [#allocation4], %s274_s26  ;;  %s3615_s23 = scalar_lea.vmem %s2573_s10, 128 }
  0x74   : > { %1151 = vmatpush2.bf16.msra.mxu0 %v3143_v39  ;;  %v3208_v39 = vld [vmem:[#allocation5 + $0x2ac] ss:$16 sps:$4 sm:$0xff]   ;;  %v3233_v62 = vld [vmem:[#allocation5 + $0x188] ss:$16 sps:$4 sm:$0xff]   ;;  %p3616_p9 = scmp.ne.s32.totalorder %s2573_s10, %s3615_s23  ;;  %p3975_p1 = scmp.ne.s32.totalorder %s3965_s28, 0 }
  0x75   : > { %1200 = vmatpush2.bf16.msra.mxu1 %v1123_v41  ;;  %1152 = vmatprep.subr.bf16.mxu0 %v3145_v40  ;;  %v3203_v40 = vld [vmem:[#allocation5 + $0x28] ss:$16 sps:$4 sm:$0xff]   ;;  %v3247_v8 = vld [vmem:[#allocation5 + $0x14c] ss:$16 sps:$4 sm:$0xff]   ;;  %s3698_s22 = smov [#allocation10]  }
  0x76   : > { %1201 = vmatprep.subr.bf16.mxu1 %v3147_v44  ;;  %v3206_v41 = vld [vmem:[#allocation5 + $0x2a8] ss:$16 sps:$4 sm:$0xff]   ;;  %v3214_v44 = vld [vmem:[#allocation5 + $0x28c] ss:$16 sps:$4 sm:$0xff]   ;;  %p3617_p3 = pnand %p3616_p9, %p3975_p1  ;;  %s3619_s12 = sshll.u32 %s3698_s22, 4  ;;  %s3620_s12 = int_to_ptr.vmem [resolvable:$false] %s3619_s12 }
  0x77   : > { %v3236_v63 = vld [vmem:[#allocation5 + $0x208] ss:$16 sps:$4 sm:$0xff]   ;;  %v3250_v9 = vld [vmem:[#allocation5 + $0x34c] ss:$16 sps:$4 sm:$0xff]   ;;  %s3621_s30 = scalar_lea.vmem %s3620_s12, 256  ;;  %p3622_p4 = scmp.lt.s32.totalorder %s2573_s10, %s3620_s12 }
  0x78   : > { %1153 = vmatpush2.bf16.msra.mxu0 %v3149_v46  ;;  %v3212_v46 = vld [vmem:[#allocation5 + $0x288] ss:$16 sps:$4 sm:$0xff]   ;;  %v3253_v12 = vld [vmem:[#allocation5 + $0x12c] ss:$16 sps:$4 sm:$0xff]   ;;  %p3618_p2 = pneg %p3617_p3  ;;  %p3623_p5 = scmp.lt.s32.totalorder %s3621_s30, %s3615_s23 }
  0x79   : > { %1202 = vmatpush2.bf16.msra.mxu1 %v3150_v47  ;;  %1154 = vmatprep.subr.bf16.mxu0 %v3151_v51  ;;  %v3217_v47 = vld [vmem:[#allocation5 + $0x1ec] ss:$16 sps:$4 sm:$0xff]   ;;  %v3242_v1 = vld [vmem:[#allocation5 + $0x368] ss:$16 sps:$4 sm:$0x1f]  }
  0x7a   : > { %1203 = vmatprep.subr.bf16.mxu1 %v3153_v52  ;;  %v3223_v51 = vld [vmem:[#allocation5 + $0x1cc] ss:$16 sps:$4 sm:$0xff]   ;;  %p3624_p7 = por %p3623_p5, %p3622_p4 }
  0x7b   : > { %v3226_v52 = vld [vmem:[#allocation5 + $0x24c] ss:$16 sps:$4 sm:$0xff]  }
  0x7c   : > { %1155 = vmatpush2.bf16.msra.mxu0 %v3155_v54  ;;  %v3224_v54 = vld [vmem:[#allocation5 + $0x248] ss:$16 sps:$4 sm:$0xff]   ;;  %p3625_p8 = pnand %p3624_p7, %p3618_p2 }
  0x7d   : > { %1204 = vmatpush2.bf16.msra.mxu1 %v3156_v57  ;;  %1156 = vmatprep.subr.bf16.mxu0 %v3157_v58  ;;  %v3227_v57 = vld [vmem:[#allocation5 + $0x1a8] ss:$16 sps:$4 sm:$0xff]  }
  0x7e   : > { %1205 = vmatprep.subr.bf16.mxu1 %v3159_v59  ;;  %v3230_v58 = vld [vmem:[#allocation5 + $0x228] ss:$16 sps:$4 sm:$0xff]   ;;  %v3235_v59 = vld [vmem:[#allocation5 + $0x18c] ss:$16 sps:$4 sm:$0xff]  }
  0x80   : > { %1157 = vmatpush2.bf16.msra.mxu0 %v3161_v60  ;;  %v3238_v60 = vld [vmem:[#allocation5 + $0x20c] ss:$16 sps:$4 sm:$0xff]  }
  0x81   : > { %1206 = vmatpush2.bf16.msra.mxu1 %v3162_v61  ;;  %1158 = vmatprep.subr.bf16.mxu0 %v3165_v2  ;;  %v3244_v61 = vld [vmem:[#allocation5 + $0x36c] ss:$16 sps:$4 sm:$0x1f]  }
  0x82   : > { %1216 = vmatprep.subr.bf16.mxu1 %v3169_v3  ;;  %v3241_v2 = vld [vmem:[#allocation5 + $0x16c] ss:$16 sps:$4 sm:$0xff]   ;;  %v1132_v3 = vand.u32 %v3244_v61, %v3840_v33 }
  0x84   : > { %1208 = vmatmul.mubr.bf16.vlgmr.msra.gmra.mxu1 %v3866_v5  ;;  %1159 = vmatpush2.bf16.msra.mxu0 %v3170_v7  ;;  %v1129_v7 = vand.u32 %v3242_v1, %v3840_v33  ;;  %v3317_v1 = vld [vmem:[#allocation2 + $0x1c0] ss:$16 sps:$4 sm:$0xff]  }
  0x85   : > { %1217 = vmatpush1.bf16.msra.mxu1 %v3167_v6  ;;  %1160 = vmatprep.subr.bf16.mxu0 %v3171_v10  ;;  %v3239_v6 = vld [vmem:[#allocation5 + $0x168] ss:$16 sps:$4 sm:$0xff]  }
  0x86   : > { %1218 = vmatprep.subr.bf16.mxu1 %v3175_v11  ;;  %1248 = vmatprep.mubr.bf16.mxu1 %v540_v16  ;;  %v3245_v10 = vld [vmem:[#allocation5 + $0x148] ss:$16 sps:$4 sm:$0xff]  }
  0x87   : > { %v3248_v11 = vld [vmem:[#allocation5 + $0x348] ss:$16 sps:$4 sm:$0xff]  }
  0x88   : > { %1161 = vmatpush2.bf16.msra.mxu0 %v3176_v14  ;;  %v3251_v14 = vld [vmem:[#allocation5 + $0x128] ss:$16 sps:$4 sm:$0xff]  }
  0x89   : > { %1219 = vmatpush1.bf16.msra.mxu1 %v3173_v13  ;;  %1162 = vmatprep.subr.bf16.mxu0 %v3177_v17  ;;  %v3256_v13 = vld [vmem:[#allocation5 + $0x32c] ss:$16 sps:$4 sm:$0xff]   ;;  %v3254_v16 = vld [vmem:[#allocation5 + $0x328] ss:$16 sps:$4 sm:$0xff]  }
  0x8a   : > { %1220 = vmatprep.subr.bf16.mxu1 %v3181_v18  ;;  %v3259_v17 = vld [vmem:[#allocation5 + $0x10c] ss:$16 sps:$4 sm:$0xff]  }
  0x8b   : > { %v3262_v18 = vld [vmem:[#allocation5 + $0x30c] ss:$16 sps:$4 sm:$0xff]  }
  0x8c   : > { %1163 = vmatpush2.bf16.msra.mxu0 %v3182_v20  ;;  %v3260_v20 = vld [vmem:[#allocation5 + $0x308] ss:$16 sps:$4 sm:$0xff]  }
  0x8d   : > { %1221 = vmatpush1.bf16.msra.mxu1 %v3179_v19  ;;  %1164 = vmatprep.subr.bf16.mxu0 %v3183_v22  ;;  %v3257_v19 = vld [vmem:[#allocation5 + $0x108] ss:$16 sps:$4 sm:$0xff]   ;;  %v3268_v22 = vld [vmem:[#allocation2 + $0x2e4] ss:$16 sps:$4 sm:$0xff]  }
  0x8e   : > { %1222 = vmatprep.subr.bf16.mxu1 %v3187_v23  ;;  %v3263_v23 = vld [vmem:[#allocation2 + $0xe0] ss:$16 sps:$4 sm:$0xff]  }
  0x90   : > { %1165 = vmatpush2.bf16.msra.mxu0 %v3188_v25  ;;  %v3271_v25 = vld [vmem:[#allocation2 + $0xc4] ss:$16 sps:$4 sm:$0xff]  }
  0x91   : > { %1223 = vmatpush1.bf16.msra.mxu1 %v3185_v24  ;;  %1257 = vmatprep.subr.bf16.mxu0 %v3196_v29  ;;  %v3266_v24 = vld [vmem:[#allocation2 + $0x2e0] ss:$16 sps:$4 sm:$0xff]  }
  0x92   : > { %1224 = vmatprep.subr.bf16.mxu1 %v3193_v28  ;;  %v3889_v28 = vcombine.high %v3860_v0, %v3860_v0  ;;  %v3269_v29 = vld [vmem:[#allocation2 + $0xc0] ss:$16 sps:$4 sm:$0xff]  }
  0x93   : > { %1167 = vmatmul.mubr.bf16.vlgmr.msra.gmra.mxu0 %v3876_v30 }
  0x94   : > { %1258 = vmatpush1.bf16.msra.mxu0 %v3194_v32  ;;  %2804 = vmatprep.mubr.msk.bf16.mxu0 %vm1114_vm2, %v3855_v55  ;;  %v3229_v55 = vld [vmem:[#allocation5 + $0x1ac] ss:$16 sps:$4 sm:$0xff]   ;;  %v3277_v32 = vld [vmem:[#allocation2 + $0xa4] ss:$16 sps:$4 sm:$0xff]  }
  0x95   : > { %1225 = vmatpush1.bf16.msra.mxu1 %v3191_v31  ;;  %1259 = vmatprep.subr.bf16.mxu0 %v3202_v35  ;;  %v3272_v31 = vld [vmem:[#allocation2 + $0x2c0] ss:$16 sps:$4 sm:$0xff]  }
  0x96   : > { %1226 = vmatprep.subr.bf16.mxu1 %v3199_v34  ;;  %v3280_v34 = vld [vmem:[#allocation2 + $0x2a4] ss:$16 sps:$4 sm:$0xff]   ;;  %v3275_v35 = vld [vmem:[#allocation2 + $0xa0] ss:$16 sps:$4 sm:$0xff]  }
  0x98   : > { %1260 = vmatpush1.bf16.msra.mxu0 %v3200_v37  ;;  %v3281_v37 = vld [vmem:[#allocation2 + $0x80] ss:$16 sps:$4 sm:$0xff]  }
  0x99   : > { %1227 = vmatpush1.bf16.msra.mxu1 %v3197_v36  ;;  %1261 = vmatprep.subr.bf16.mxu0 %v3208_v39  ;;  %v3278_v36 = vld [vmem:[#allocation2 + $0x2a0] ss:$16 sps:$4 sm:$0xff]   ;;  %v3289_v39 = vld [vmem:[#allocation2 + $0x64] ss:$16 sps:$4 sm:$0xff]  }
  0x9a   : > { %1228 = vmatprep.subr.bf16.mxu1 %v3205_v38  ;;  %v3284_v38 = vld [vmem:[#allocation2 + $0x280] ss:$16 sps:$4 sm:$0xff]  }
  0x9c   : > { %1262 = vmatpush1.bf16.msra.mxu0 %v3206_v41  ;;  %v3287_v41 = vld [vmem:[#allocation2 + $0x60] ss:$16 sps:$4 sm:$0xff]  }
  0x9d   : > { %1229 = vmatpush1.bf16.msra.mxu1 %v3203_v40  ;;  %1263 = vmatprep.subr.bf16.mxu0 %v3214_v44  ;;  %v3292_v40 = vld [vmem:[#allocation2 + $0x264] ss:$16 sps:$4 sm:$0xff]  }
  0x9e   : > { %1230 = vmatprep.subr.bf16.mxu1 %v3211_v43  ;;  %v3290_v43 = vld [vmem:[#allocation2 + $0x260] ss:$16 sps:$4 sm:$0xff]   ;;  %v3295_v44 = vld [vmem:[#allocation2 + $0x44] ss:$16 sps:$4 sm:$0xff]  }
  0xa0   : > { %1264 = vmatpush1.bf16.msra.mxu0 %v3212_v46  ;;  %v3293_v46 = vld [vmem:[#allocation2 + $0x40] ss:$16 sps:$4 sm:$0xff]  }
  0xa1   : > { %1231 = vmatpush1.bf16.msra.mxu1 %v3209_v45  ;;  %1265 = vmatprep.subr.bf16.mxu0 %v3220_v48  ;;  %v3298_v45 = vld [vmem:[#allocation2 + $0x244] ss:$16 sps:$4 sm:$0xff]  }
  0xa2   : > { %1232 = vmatprep.subr.bf16.mxu1 %v3217_v47  ;;  %v3296_v47 = vld [vmem:[#allocation2 + $0x240] ss:$16 sps:$4 sm:$0xff]   ;;  %v3301_v48 = vld [vmem:[#allocation2 + $0x24] ss:$16 sps:$4 sm:$0xff]  }
  0xa4   : > { %1266 = vmatpush1.bf16.msra.mxu0 %v3218_v50  ;;  %v3299_v50 = vld [vmem:[#allocation2 + $0x20] ss:$16 sps:$4 sm:$0xff]  }
  0xa5   : > { %1233 = vmatpush2.bf16.msra.mxu1 %v3215_v49  ;;  %1267 = vmatprep.subr.bf16.mxu0 %v3226_v52  ;;  %v3304_v49 = vld [vmem:[#allocation2 + $0x224] ss:$16 sps:$4 sm:$0xff]  }
  0xa6   : > { %1234 = vmatprep.subr.bf16.mxu1 %v3223_v51  ;;  %v3302_v51 = vld [vmem:[#allocation2 + $0x220] ss:$16 sps:$4 sm:$0xff]   ;;  %v3307_v52 = vld [vmem:[#allocation2 + $0x4] ss:$16 sps:$4 sm:$0xff]  }
  0xa8   : > { %1268 = vmatpush1.bf16.msra.mxu0 %v3224_v54  ;;  %v3316_v54 = vld [vmem:[#allocation2 + $0x364] ss:$16 sps:$4 sm:$0x1f]  }
  0xa9   : > { %1235 = vmatpush2.bf16.msra.mxu1 %v3221_v53  ;;  %1269 = vmatprep.subr.bf16.mxu0 %v3232_v56  ;;  %v3310_v53 = vld [vmem:[#allocation2 + $0x204] ss:$16 sps:$4 sm:$0xff]   ;;  %v3308_v56 = vld [vmem:[#allocation2 + $0x200] ss:$16 sps:$4 sm:$0xff]  }
  0xaa   : > { %1236 = vmatprep.subr.bf16.mxu1 %v3229_v55  ;;  %v3305_v55 = vld [vmem:[#allocation2] ss:$16 sps:$4 sm:$0xff]  }
  0xac   : > { %1270 = vmatpush1.bf16.msra.mxu0 %v3230_v58  ;;  %v3313_v58 = vld [vmem:[#allocation2 + $0x1e4] ss:$16 sps:$4 sm:$0xff]  }
  0xad   : > { %1237 = vmatpush2.bf16.msra.mxu1 %v3227_v57  ;;  %1271 = vmatprep.subr.bf16.mxu0 %v3238_v60  ;;  %v3314_v57 = vld [vmem:[#allocation2 + $0x360] ss:$16 sps:$4 sm:$0x1f]  }
  0xae   : > { %1238 = vmatprep.subr.bf16.mxu1 %v3235_v59  ;;  %v1868_v59 = vand.u32 %v3316_v54, %v3840_v33  ;;  %v3311_v60 = vld [vmem:[#allocation2 + $0x1e0] ss:$16 sps:$4 sm:$0xff]   ;;  %v1865_v61 = vand.u32 %v3314_v57, %v3840_v33  ;;  %v3396_v54 = vld [vmem:[#allocation2 + $0x248] ss:$16 sps:$4 sm:$0xff]  }
  0xaf   : > { %v3399_v57 = vld [vmem:[#allocation2 + $0x1a8] ss:$16 sps:$4 sm:$0xff]  }
  0xb0   : > { %1272 = vmatpush1.bf16.msra.mxu0 %v3236_v63  ;;  %v3322_v63 = vld [vmem:[#allocation2 + $0x344] ss:$16 sps:$4 sm:$0xff]  }
  0xb1   : > { %1239 = vmatpush2.bf16.msra.mxu1 %v3233_v62  ;;  %1281 = vmatprep.subr.bf16.mxu0 %v1132_v3  ;;  %v3319_v62 = vld [vmem:[#allocation2 + $0x1c4] ss:$16 sps:$4 sm:$0xff]  }
  0xb2   : > { %1240 = vmatprep.subr.bf16.mxu1 %v3241_v2  ;;  %v3320_v2 = vld [vmem:[#allocation2 + $0x340] ss:$16 sps:$4 sm:$0xff]   ;;  %v3325_v3 = vld [vmem:[#allocation2 + $0x1a4] ss:$16 sps:$4 sm:$0xff]  }
  0xb4   : > { %1282 = vmatpush2.bf16.msra.mxu0 %v1129_v7  ;;  %v3323_v7 = vld [vmem:[#allocation2 + $0x1a0] ss:$16 sps:$4 sm:$0xff]  }
  0xb5   : > { %1241 = vmatpush2.bf16.msra.mxu1 %v3239_v6  ;;  %1283 = vmatprep.subr.bf16.mxu0 %v3250_v9  ;;  %v3328_v6 = vld [vmem:[#allocation2 + $0x324] ss:$16 sps:$4 sm:$0xff]  }
  0xb6   : > { %1242 = vmatprep.subr.bf16.mxu1 %v3247_v8  ;;  %v3326_v8 = vld [vmem:[#allocation2 + $0x320] ss:$16 sps:$4 sm:$0xff]   ;;  %v3331_v9 = vld [vmem:[#allocation2 + $0x184] ss:$16 sps:$4 sm:$0xff]  }
  0xb8   : > { %1284 = vmatpush2.bf16.msra.mxu0 %v3248_v11  ;;  %v3329_v11 = vld [vmem:[#allocation2 + $0x180] ss:$16 sps:$4 sm:$0xff]  }
  0xb9   : > { %1243 = vmatpush2.bf16.msra.mxu1 %v3245_v10  ;;  %1285 = vmatprep.subr.bf16.mxu0 %v3256_v13  ;;  %v3334_v10 = vld [vmem:[#allocation2 + $0x304] ss:$16 sps:$4 sm:$0xff]  }
  0xba   : > { %1244 = vmatprep.subr.bf16.mxu1 %v3253_v12  ;;  %v3332_v12 = vld [vmem:[#allocation2 + $0x300] ss:$16 sps:$4 sm:$0xff]   ;;  %v3338_v13 = vld [vmem:[#allocation2 + $0x164] ss:$16 sps:$4 sm:$0xff]  }
  0xbc   : > { %1286 = vmatpush2.bf16.msra.mxu0 %v3254_v16  ;;  %v3336_v16 = vld [vmem:[#allocation2 + $0x160] ss:$16 sps:$4 sm:$0xff]  }
  0xbd   : > { %1245 = vmatpush2.bf16.msra.mxu1 %v3251_v14  ;;  %1287 = vmatprep.subr.bf16.mxu0 %v3262_v18  ;;  %v3342_v14 = vld [vmem:[#allocation2 + $0xec] ss:$16 sps:$4 sm:$0xff]   ;;  %v3340_v18 = vld [vmem:[#allocation2 + $0xe8] ss:$16 sps:$4 sm:$0xff]  }
  0xbe   : > { %1246 = vmatprep.subr.bf16.mxu1 %v3259_v17  ;;  %v3900_v17 = vcombine.low %v3850_v42, %v3850_v42  ;;  %v3349_v42 = vld [vmem:[#allocation2 + $0x120] ss:$16 sps:$4 sm:$0xff]  }
  0xc0   : > { %1288 = vmatpush2.bf16.msra.mxu0 %v3260_v20  ;;  %v3348_v20 = vld [vmem:[#allocation2 + $0xcc] ss:$16 sps:$4 sm:$0xff]  }
  0xc1   : > { %1247 = vmatpush2.bf16.msra.mxu1 %v3257_v19  ;;  %1876 = vmatprep.subr.bf16.mxu0 %v3265_v21  ;;  %v3345_v19 = vld [vmem:[#allocation2 + $0x144] ss:$16 sps:$4 sm:$0xff]   ;;  %v3343_v21 = vld [vmem:[#allocation2 + $0x140] ss:$16 sps:$4 sm:$0xff]  }
  0xc2   : > { %1917 = vmatprep.subr.bf16.mxu1 %v3268_v22  ;;  %v3346_v22 = vld [vmem:[#allocation2 + $0xc8] ss:$16 sps:$4 sm:$0xff]  }
  0xc3   : > { %1290 = vmatmul.mubr.bf16.vlgmr.msra.gmra.mxu0 %v3866_v5  ;;  %v3286_v5 = vld [vmem:[#allocation2 + $0x284] ss:$16 sps:$4 sm:$0xff]  }
  0xc4   : > { %1249 = vmatmul.mubr.bf16.vlgmr.msra.gmra.mxu1 %v3876_v30  ;;  %1877 = vmatpush1.bf16.msra.mxu0 %v3263_v23  ;;  %v3283_v30 = vld [vmem:[#allocation2 + $0x84] ss:$16 sps:$4 sm:$0xff]  }
  0xc5   : > { %1918 = vmatpush1.bf16.msra.mxu1 %v3266_v24  ;;  %1878 = vmatprep.subr.bf16.mxu0 %v3271_v25  ;;  %v3351_v23 = vld [vmem:[#allocation2 + $0x124] ss:$16 sps:$4 sm:$0xff]   ;;  %v3354_v24 = vld [vmem:[#allocation2 + $0xac] ss:$16 sps:$4 sm:$0xff]   ;;  %v3352_v25 = vld [vmem:[#allocation2 + $0xa8] ss:$16 sps:$4 sm:$0xff]  }
  0xc6   : > { %1919 = vmatprep.subr.bf16.mxu1 %v3274_v26  ;;  %2921 = vmatprep.mubr.msk.bf16.mxu1 %vm1114_vm2, %v3885_v27  ;;  %v3357_v26 = vld [vmem:[#allocation2 + $0x104] ss:$16 sps:$4 sm:$0xff]  }
  0xc7   : > { %1908 = vmatprep.mubr.bf16.mxu0 %v3889_v28 }
  0xc8   : > { %1879 = vmatpush1.bf16.msra.mxu0 %v3269_v29  ;;  %v3360_v29 = vld [vmem:[#allocation2 + $0x8c] ss:$16 sps:$4 sm:$0xff]  }
  0xc9   : > { %1920 = vmatpush1.bf16.msra.mxu1 %v3272_v31  ;;  %1880 = vmatprep.subr.bf16.mxu0 %v3277_v32  ;;  %v3355_v31 = vld [vmem:[#allocation2 + $0x100] ss:$16 sps:$4 sm:$0xff]   ;;  %v3358_v32 = vld [vmem:[#allocation2 + $0x88] ss:$16 sps:$4 sm:$0xff]  }
  0xca   : > { %1921 = vmatprep.subr.bf16.mxu1 %v3280_v34  ;;  %v3365_v34 = vld [vmem:[#allocation2 + $0x6c] ss:$16 sps:$4 sm:$0xff]  }
  0xcc   : > { %1881 = vmatpush1.bf16.msra.mxu0 %v3275_v35  ;;  %v3368_v35 = vld [vmem:[#allocation2 + $0x2ec] ss:$16 sps:$4 sm:$0xff]  }
  0xcd   : > { %1922 = vmatpush1.bf16.msra.mxu1 %v3278_v36  ;;  %1882 = vmatprep.subr.bf16.mxu0 %v3283_v30  ;;  %v3906_v36 = vcombine.low %v3860_v0, %v3860_v0  ;;  %v3366_v30 = vld [vmem:[#allocation2 + $0x2e8] ss:$16 sps:$4 sm:$0xff]  }
  0xce   : > { %1923 = vmatprep.subr.bf16.mxu1 %v3286_v5  ;;  %v3371_v5 = vld [vmem:[#allocation2 + $0x4c] ss:$16 sps:$4 sm:$0xff]   ;;  %v3375_v0 = vld [vmem:[#allocation2 + $0x28] ss:$16 sps:$4 sm:$0xff]  }
  0xd0   : > { %1883 = vmatpush1.bf16.msra.mxu0 %v3281_v37  ;;  %v3374_v37 = vld [vmem:[#allocation2 + $0x2cc] ss:$16 sps:$4 sm:$0xff]  }
  0xd1   : > { %1924 = vmatpush1.bf16.msra.mxu1 %v3284_v38  ;;  %1884 = vmatprep.subr.bf16.mxu0 %v3289_v39  ;;  %v3369_v38 = vld [vmem:[#allocation2 + $0x48] ss:$16 sps:$4 sm:$0xff]  }
  0xd2   : > { %1925 = vmatprep.subr.bf16.mxu1 %v3292_v40  ;;  %v3372_v39 = vld [vmem:[#allocation2 + $0x2c8] ss:$16 sps:$4 sm:$0xff]   ;;  %v3377_v40 = vld [vmem:[#allocation2 + $0x2c] ss:$16 sps:$4 sm:$0xff]  }
  0xd4   : > { %1885 = vmatpush1.bf16.msra.mxu0 %v3287_v41  ;;  %v3380_v41 = vld [vmem:[#allocation2 + $0x2ac] ss:$16 sps:$4 sm:$0xff]  }
  0xd5   : > { %1926 = vmatpush1.bf16.msra.mxu1 %v3290_v43  ;;  %1886 = vmatprep.subr.bf16.mxu0 %v3295_v44  ;;  %v3378_v43 = vld [vmem:[#allocation2 + $0x2a8] ss:$16 sps:$4 sm:$0xff]   ;;  %v3383_v44 = vld [vmem:[#allocation2 + $0xc] ss:$16 sps:$4 sm:$0xff]  }
  0xd6   : > { %1927 = vmatprep.subr.bf16.mxu1 %v3298_v45  ;;  %v3386_v45 = vld [vmem:[#allocation2 + $0x28c] ss:$16 sps:$4 sm:$0xff]  }
  0xd8   : > { %1887 = vmatpush1.bf16.msra.mxu0 %v3293_v46  ;;  %v3381_v46 = vld [vmem:[#allocation2 + $0x8] ss:$16 sps:$4 sm:$0xff]  }
  0xd9   : > { %1928 = vmatpush1.bf16.msra.mxu1 %v3296_v47  ;;  %1888 = vmatprep.subr.bf16.mxu0 %v3301_v48  ;;  %v3384_v47 = vld [vmem:[#allocation2 + $0x288] ss:$16 sps:$4 sm:$0xff]   ;;  %v3389_v48 = vld [vmem:[#allocation2 + $0x1ec] ss:$16 sps:$4 sm:$0xff]  }
  0xda   : > { %1929 = vmatprep.subr.bf16.mxu1 %v3304_v49  ;;  %v3392_v49 = vld [vmem:[#allocation2 + $0x26c] ss:$16 sps:$4 sm:$0xff]  }
  0xdc   : > { %1889 = vmatpush1.bf16.msra.mxu0 %v3299_v50  ;;  %v3387_v50 = vld [vmem:[#allocation2 + $0x1e8] ss:$16 sps:$4 sm:$0xff]  }
  0xdd   : > { %1930 = vmatpush1.bf16.msra.mxu1 %v3302_v51  ;;  %1890 = vmatprep.subr.bf16.mxu0 %v3307_v52  ;;  %v3390_v51 = vld [vmem:[#allocation2 + $0x268] ss:$16 sps:$4 sm:$0xff]   ;;  %v3398_v52 = vld [vmem:[#allocation2 + $0x24c] ss:$16 sps:$4 sm:$0xff]  }
  0xde   : > { %1931 = vmatprep.subr.bf16.mxu1 %v3310_v53  ;;  %v3393_v53 = vld [vmem:[#allocation2 + $0x1c8] ss:$16 sps:$4 sm:$0xff]  }
  0xe0   : > { %1891 = vmatpush1.bf16.msra.mxu0 %v3305_v55  ;;  %v3401_v55 = vld [vmem:[#allocation2 + $0x1ac] ss:$16 sps:$4 sm:$0xff]  }
  0xe1   : > { %1932 = vmatpush1.bf16.msra.mxu1 %v3308_v56  ;;  %1892 = vmatprep.subr.bf16.mxu0 %v3313_v58  ;;  %v3404_v56 = vld [vmem:[#allocation2 + $0x22c] ss:$16 sps:$4 sm:$0xff]   ;;  %v3402_v58 = vld [vmem:[#allocation2 + $0x228] ss:$16 sps:$4 sm:$0xff]  }
  0xe2   : > { %1941 = vmatprep.subr.bf16.mxu1 %v1868_v59  ;;  %v3407_v59 = vld [vmem:[#allocation2 + $0x18c] ss:$16 sps:$4 sm:$0xff]  }
  0xe4   : > { %1893 = vmatpush2.bf16.msra.mxu0 %v3311_v60  ;;  %v3410_v60 = vld [vmem:[#allocation2 + $0x20c] ss:$16 sps:$4 sm:$0xff]  }
  0xe5   : > { %1942 = vmatpush2.bf16.msra.mxu1 %v1865_v61  ;;  %1894 = vmatprep.subr.bf16.mxu0 %v3319_v62  ;;  %v3416_v61 = vld [vmem:[#allocation2 + $0x36c] ss:$16 sps:$4 sm:$0x1f]   ;;  %v3405_v62 = vld [vmem:[#allocation2 + $0x188] ss:$16 sps:$4 sm:$0xff]  }
  0xe6   : > { %1943 = vmatprep.subr.bf16.mxu1 %v3322_v63  ;;  %v3408_v63 = vld [vmem:[#allocation2 + $0x208] ss:$16 sps:$4 sm:$0xff]  }
  0xe8   : > { %1895 = vmatpush2.bf16.msra.mxu0 %v3317_v1  ;;  %v3414_v1 = vld [vmem:[#allocation2 + $0x368] ss:$16 sps:$4 sm:$0x1f]  }
  0xe9   : > { %1944 = vmatpush2.bf16.msra.mxu1 %v3320_v2  ;;  %1896 = vmatprep.subr.bf16.mxu0 %v3325_v3  ;;  %v3413_v2 = vld [vmem:[#allocation2 + $0x16c] ss:$16 sps:$4 sm:$0xff]   ;;  %v1874_v3 = vand.u32 %v3416_v61, %v3840_v33 }
  0xea   : > { %1945 = vmatprep.subr.bf16.mxu1 %v3328_v6  ;;  %v3411_v6 = vld [vmem:[#allocation2 + $0x168] ss:$16 sps:$4 sm:$0xff]  }
  0xec   : > { %1897 = vmatpush2.bf16.msra.mxu0 %v3323_v7  ;;  %v1871_v7 = vand.u32 %v3414_v1, %v3840_v33  ;;  %v3434_v33 = vld [vmem:[#allocation2 + $0x30c] ss:$16 sps:$4 sm:$0xff]  }
  0xed   : > { %1946 = vmatpush2.bf16.msra.mxu1 %v3326_v8  ;;  %1898 = vmatprep.subr.bf16.mxu0 %v3331_v9  ;;  %v3419_v8 = vld [vmem:[#allocation2 + $0x14c] ss:$16 sps:$4 sm:$0xff]  }
  0xee   : > { %1947 = vmatprep.subr.bf16.mxu1 %v3334_v10  ;;  %v3422_v9 = vld [vmem:[#allocation2 + $0x34c] ss:$16 sps:$4 sm:$0xff]   ;;  %v3417_v10 = vld [vmem:[#allocation2 + $0x148] ss:$16 sps:$4 sm:$0xff]  }
  0xf0   : > { %1899 = vmatpush2.bf16.msra.mxu0 %v3329_v11  ;;  %v3420_v11 = vld [vmem:[#allocation2 + $0x348] ss:$16 sps:$4 sm:$0xff]  }
  0xf1   : > { %1948 = vmatpush2.bf16.msra.mxu1 %v3332_v12  ;;  %1900 = vmatprep.subr.bf16.mxu0 %v3338_v13  ;;  %v3425_v12 = vld [vmem:[#allocation2 + $0x12c] ss:$16 sps:$4 sm:$0xff]  }
  0xf2   : > { %1958 = vmatprep.subr.bf16.mxu1 %v3342_v14  ;;  %v3428_v13 = vld [vmem:[#allocation2 + $0x32c] ss:$16 sps:$4 sm:$0xff]   ;;  %v3423_v14 = vld [vmem:[#allocation2 + $0x128] ss:$16 sps:$4 sm:$0xff]  }
  0xf4   : > { %1950 = vmatmul.mubr.bf16.vlgmr.msra.gmra.mxu1 %v3900_v17  ;;  %1901 = vmatpush2.bf16.msra.mxu0 %v3336_v16  ;;  %v3426_v16 = vld [vmem:[#allocation2 + $0x328] ss:$16 sps:$4 sm:$0xff]  }
  0xf5   : > { %1959 = vmatpush1.bf16.msra.mxu1 %v3340_v18  ;;  %1902 = vmatprep.subr.bf16.mxu0 %v3345_v19  ;;  %v3431_v18 = vld [vmem:[#allocation2 + $0x10c] ss:$16 sps:$4 sm:$0xff]   ;;  %v3429_v19 = vld [vmem:[#allocation2 + $0x108] ss:$16 sps:$4 sm:$0xff]  }
  0xf6   : > { %1960 = vmatprep.subr.bf16.mxu1 %v3348_v20  ;;  %1990 = vmatprep.mubr.bf16.mxu1 %v3889_v28  ;;  %v3363_v28 = vld [vmem:[#allocation2 + $0x68] ss:$16 sps:$4 sm:$0xff]  }
  0xf7   : > { %v3432_v20 = vld [vmem:[#allocation2 + $0x308] ss:$16 sps:$4 sm:$0xff]  }
  0xf8   : > { %1903 = vmatpush2.bf16.msra.mxu0 %v3343_v21  ;;  %v3437_v21 = vld [vmem:[#allocation7 + $0xe4] ss:$16 sps:$4 sm:$0xff]  }
  0xf9   : > { %1961 = vmatpush1.bf16.msra.mxu1 %v3346_v22  ;;  %1904 = vmatprep.subr.bf16.mxu0 %v3351_v23  ;;  %v3440_v22 = vld [vmem:[#allocation7 + $0xec] ss:$16 sps:$4 sm:$0xff]   ;;  %v3435_v23 = vld [vmem:[#allocation7 + $0xe0] ss:$16 sps:$4 sm:$0xff]  }
  0xfa   : > { %1962 = vmatprep.subr.bf16.mxu1 %v3354_v24  ;;  %v3438_v24 = vld [vmem:[#allocation7 + $0xe8] ss:$16 sps:$4 sm:$0xff]  }
  0xfc   : > { %1905 = vmatpush2.bf16.msra.mxu0 %v3349_v42  ;;  %v3443_v42 = vld [vmem:[#allocation7 + $0xc4] ss:$16 sps:$4 sm:$0xff]  }
  0xfd   : > { %1963 = vmatpush1.bf16.msra.mxu1 %v3352_v25  ;;  %1906 = vmatprep.subr.bf16.mxu0 %v3357_v26  ;;  %v3446_v25 = vld [vmem:[#allocation7 + $0xcc] ss:$16 sps:$4 sm:$0xff]   ;;  %v2077_v26 = vrot.slane %v3864_v4, 1  ;;  %v3455_v4 = vld [vmem:[#allocation7 + $0x84] ss:$16 sps:$4 sm:$0xff]  }
  0xfe   : > { %1964 = vmatprep.subr.bf16.mxu1 %v3360_v29  ;;  %v3441_v29 = vld [vmem:[#allocation7 + $0xc0] ss:$16 sps:$4 sm:$0xff]  }
 0x100   : > { %1907 = vmatpush2.bf16.msra.mxu0 %v3355_v31  ;;  %v3444_v31 = vld [vmem:[#allocation7 + $0xc8] ss:$16 sps:$4 sm:$0xff]  }
 0x101   : > { %1965 = vmatpush1.bf16.msra.mxu1 %v3358_v32  ;;  %1999 = vmatprep.subr.bf16.mxu0 %v3368_v35  ;;  %v3449_v32 = vld [vmem:[#allocation7 + $0xa4] ss:$16 sps:$4 sm:$0xff]   ;;  %v3447_v35 = vld [vmem:[#allocation7 + $0xa0] ss:$16 sps:$4 sm:$0xff]  }
 0x102   : > { %1966 = vmatprep.subr.bf16.mxu1 %v3365_v34  ;;  %v3452_v34 = vld [vmem:[#allocation7 + $0xac] ss:$16 sps:$4 sm:$0xff]  }
 0x103   : > { %1909 = vmatmul.mubr.bf16.vlgmr.msra.gmra.mxu0 %v3906_v36 }
 0x104   : > { %2000 = vmatpush1.bf16.msra.mxu0 %v3366_v30  ;;  %2922 = vmatprep.mubr.msk.bf16.mxu0 %vm1114_vm2, %v3885_v27  ;;  %v3395_v27 = vld [vmem:[#allocation2 + $0x1cc] ss:$16 sps:$4 sm:$0xff]   ;;  %v3456_v30 = vld [vmem:[#allocation7 + $0x88] ss:$16 sps:$4 sm:$0xff]  }
 0x105   : > { %1967 = vmatpush1.bf16.msra.mxu1 %v3363_v28  ;;  %2001 = vmatprep.subr.bf16.mxu0 %v3374_v37  ;;  %v3450_v28 = vld [vmem:[#allocation7 + $0xa8] ss:$16 sps:$4 sm:$0xff]   ;;  %v3464_v37 = vld [vmem:[#allocation7 + $0x6c] ss:$16 sps:$4 sm:$0xff]  }
 0x106   : > { %1968 = vmatprep.subr.bf16.mxu1 %v3371_v5  ;;  %v3461_v5 = vld [vmem:[#allocation7 + $0x64] ss:$16 sps:$4 sm:$0xff]  }
 0x108   : > { %2002 = vmatpush1.bf16.msra.mxu0 %v3372_v39  ;;  %v3462_v39 = vld [vmem:[#allocation7 + $0x68] ss:$16 sps:$4 sm:$0xff]  }
 0x109   : > { %1969 = vmatpush1.bf16.msra.mxu1 %v3369_v38  ;;  %2003 = vmatprep.subr.bf16.mxu0 %v3380_v41  ;;  %v3459_v38 = vld [vmem:[#allocation7 + $0x60] ss:$16 sps:$4 sm:$0xff]   ;;  %v3470_v41 = vld [vmem:[#allocation7 + $0x4c] ss:$16 sps:$4 sm:$0xff]  }
 0x10a   : > { %1970 = vmatprep.subr.bf16.mxu1 %v3377_v40  ;;  %v3467_v40 = vld [vmem:[#allocation7 + $0x44] ss:$16 sps:$4 sm:$0xff]  }
 0x10c   : > { %2004 = vmatpush1.bf16.msra.mxu0 %v3378_v43  ;;  %v3465_v43 = vld [vmem:[#allocation7 + $0x40] ss:$16 sps:$4 sm:$0xff]  }
 0x10d   : > { %1971 = vmatpush1.bf16.msra.mxu1 %v3375_v0  ;;  %2005 = vmatprep.subr.bf16.mxu0 %v3386_v45 }
 0x10e   : > { %1972 = vmatprep.subr.bf16.mxu1 %v3383_v44  ;;  %v3468_v44 = vld [vmem:[#allocation7 + $0x48] ss:$16 sps:$4 sm:$0xff]  }
 0x110   : > { %2006 = vmatpush1.bf16.msra.mxu0 %v3384_v47  ;;  %v3476_v47 = vld [vmem:[#allocation7 + $0x2c] ss:$16 sps:$4 sm:$0xff]  }
 0x111   : > { %1973 = vmatpush1.bf16.msra.mxu1 %v3381_v46  ;;  %2007 = vmatprep.subr.bf16.mxu0 %v3392_v49  ;;  %v3473_v46 = vld [vmem:[#allocation7 + $0x24] ss:$16 sps:$4 sm:$0xff]   ;;  %v3471_v49 = vld [vmem:[#allocation7 + $0x20] ss:$16 sps:$4 sm:$0xff]  }
 0x112   : > { %1974 = vmatprep.subr.bf16.mxu1 %v3389_v48 }
 0x114   : > { %2008 = vmatpush1.bf16.msra.mxu0 %v3390_v51 }
 0x115   : > { %1975 = vmatpush2.bf16.msra.mxu1 %v3387_v50  ;;  %2009 = vmatprep.subr.bf16.mxu0 %v3398_v52  ;;  %v3474_v50 = vld [vmem:[#allocation7 + $0x28] ss:$16 sps:$4 sm:$0xff]   ;;  %v3482_v52 = vld [vmem:[#allocation7 + $0xc] ss:$16 sps:$4 sm:$0xff]  }
 0x116   : > { %1976 = vmatprep.subr.bf16.mxu1 %v3395_v27  ;;  %v3479_v27 = vld [vmem:[#allocation7 + $0x4] ss:$16 sps:$4 sm:$0xff]  }
 0x118   : > { %2010 = vmatpush1.bf16.msra.mxu0 %v3396_v54  ;;  %v3480_v54 = vld [vmem:[#allocation7 + $0x8] ss:$16 sps:$4 sm:$0xff]  }
 0x119   : > { %1977 = vmatpush2.bf16.msra.mxu1 %v3393_v53  ;;  %2011 = vmatprep.subr.bf16.mxu0 %v3404_v56  ;;  %v3477_v53 = vld [vmem:[#allocation7] ss:$16 sps:$4 sm:$0xff]   ;;  %v3485_v56 = vld [vmem:[#allocation7 + $0x10c] ss:$16 sps:$4 sm:$0x7f]  }
 0x11a   : > { %1978 = vmatprep.subr.bf16.mxu1 %v3401_v55  ;;  %v3483_v55 = vld [vmem:[#allocation7 + $0x104] ss:$16 sps:$4 sm:$0x7f]  }
 0x11c   : > { %2012 = vmatpush1.bf16.msra.mxu0 %v3402_v58  ;;  %v3488_v58 = vld [vmem:[#allocation7 + $0x108] ss:$16 sps:$4 sm:$0x7f]  }
 0x11d   : > { %1979 = vmatpush2.bf16.msra.mxu1 %v3399_v57  ;;  %2013 = vmatprep.subr.bf16.mxu0 %v3410_v60  ;;  %v3487_v57 = vld [vmem:[#allocation7 + $0x100] ss:$16 sps:$4 sm:$0x7f]   ;;  %v2267_v60 = vsel %vm2259_vm4, %v3488_v58, 0 }
 0x11e   : > { %1980 = vmatprep.subr.bf16.mxu1 %v3407_v59  ;;  %v2261_v59 = vsel %vm2259_vm4, %v3487_v57, 0 }
 0x120   : > { %2014 = vmatpush1.bf16.msra.mxu0 %v3408_v63 }
 0x121   : > { %1981 = vmatpush2.bf16.msra.mxu1 %v3405_v62  ;;  %2023 = vmatprep.subr.bf16.mxu0 %v1874_v3  ;;  %v2076_v62 = vrot.slane %v3872_v15, 1 }
 0x122   : > { %1982 = vmatprep.subr.bf16.mxu1 %v3413_v2 }
 0x124   : > { %2024 = vmatpush2.bf16.msra.mxu0 %v1871_v7  ;;  %v3489_v7 = vld [vmem:[#allocation8 + $0x78] sm:$0xff]  }
 0x125   : > { %1983 = vmatpush2.bf16.msra.mxu1 %v3411_v6  ;;  %2025 = vmatprep.subr.bf16.mxu0 %v3422_v9 }
 0x126   : > { %1984 = vmatprep.subr.bf16.mxu1 %v3419_v8  ;;  %v3490_v8 = vld [vmem:[#allocation8 + $0x38] sm:$0xff]  }
 0x128   : > { %2026 = vmatpush2.bf16.msra.mxu0 %v3420_v11 }
 0x129   : > { %1985 = vmatpush2.bf16.msra.mxu1 %v3417_v10  ;;  %2027 = vmatprep.subr.bf16.mxu0 %v3428_v13 }
 0x12a   : > { %1986 = vmatprep.subr.bf16.mxu1 %v3425_v12 }
 0x12c   : > { %2028 = vmatpush2.bf16.msra.mxu0 %v3426_v16 }
 0x12d   : > { %1987 = vmatpush2.bf16.msra.mxu1 %v3423_v14  ;;  %2029 = vmatprep.subr.bf16.mxu0 %v3434_v33 }
 0x12e   : > { %1988 = vmatprep.subr.bf16.mxu1 %v3431_v18 }
 0x130   : > { %2030 = vmatpush2.bf16.msra.mxu0 %v3432_v20  ;;  %v3492_v20 = vld [vmem:[#allocation8 + $0x30] sm:$0xff]  }
 0x131   : > { %1989 = vmatpush2.bf16.msra.mxu1 %v3429_v19  ;;  %2272 = vmatprep.subr.bf16.mxu0 %v3437_v21  ;;  %v3491_v19 = vld [vmem:[#allocation8 + $0x70] sm:$0xff]   ;;  %v3493_v21 = vld [vmem:[#allocation8 + $0x68] sm:$0xff]  }
 0x132   : > { %2313 = vmatprep.subr.bf16.mxu1 %v3440_v22  ;;  %v3494_v22 = vld [vmem:[#allocation8 + $0x28] sm:$0xff]  }
 0x133   : > { %2032 = vmatmul.mubr.bf16.vlgmr.msra.gmra.mxu0 %v3900_v17  ;;  %v3453_v17 = vld [vmem:[#allocation7 + $0x80] ss:$16 sps:$4 sm:$0xff]  }
 0x134   : > { %1991 = vmatmul.mubr.bf16.vlgmr.msra.gmra.mxu1 %v3906_v36  ;;  %2273 = vmatpush1.bf16.msra.mxu0 %v3435_v23  ;;  %v3458_v36 = vld [vmem:[#allocation7 + $0x8c] ss:$16 sps:$4 sm:$0xff]   ;;  %v3495_v23 = vld [vmem:[#allocation8 + $0x60] sm:$0xff]  }
 0x135   : > { %2314 = vmatpush1.bf16.msra.mxu1 %v3438_v24  ;;  %2274 = vmatprep.subr.bf16.mxu0 %v3443_v42  ;;  %v3496_v24 = vld [vmem:[#allocation8 + $0x20] sm:$0xff]   ;;  %v3497_v42 = vld [vmem:[#allocation8 + $0x58] sm:$0xff]  }
 0x136   : > { %2315 = vmatprep.subr.bf16.mxu1 %v3446_v25  ;;  %2960 = vmatprep.mubr.msk.bf16.mxu0 %vm2255_vm3, %v2077_v26  ;;  %v3498_v25 = vld [vmem:[#allocation8 + $0x18] sm:$0xff]  }
 0x137   : > { %2962 = vmatprep.mubr.msk.bf16.mxu1 %vm2255_vm3, %v2077_v26  ;;  %v3499_v26 = vld [vmem:[#allocation8 + $0x50] sm:$0xff]  }
 0x138   : > { %2275 = vmatpush1.bf16.msra.mxu0 %v3441_v29  ;;  %v3500_v29 = vld [vmem:[#allocation8 + $0x10] sm:$0xff]  }
 0x139   : > { %2316 = vmatpush1.bf16.msra.mxu1 %v3444_v31  ;;  %2276 = vmatprep.subr.bf16.mxu0 %v3449_v32  ;;  %v3501_v31 = vld [vmem:[#allocation8 + $0x48] sm:$0xff]  }
 0x13a   : > { %2317 = vmatprep.subr.bf16.mxu1 %v3452_v34  ;;  %v3502_v32 = vld [vmem:[#allocation8 + $0x8] sm:$0xff]   ;;  %v3503_v34 = vld [vmem:[#allocation8 + $0x40] sm:$0xff]  }
 0x13c   : > { %2277 = vmatpush1.bf16.msra.mxu0 %v3447_v35  ;;  %v3504_v35 = vld [vmem:[#allocation8] sm:$0xff]  }
 0x13d   : > { %2318 = vmatpush1.bf16.msra.mxu1 %v3450_v28  ;;  %2278 = vmatprep.subr.bf16.mxu0 %v3455_v4 }
 0x13e   : > { %2319 = vmatprep.subr.bf16.mxu1 %v3458_v36 }
 0x140   : > { %2279 = vmatpush1.bf16.msra.mxu0 %v3453_v17 }
 0x141   : > { %2320 = vmatpush1.bf16.msra.mxu1 %v3456_v30  ;;  %2280 = vmatprep.subr.bf16.mxu0 %v3461_v5 }
 0x142   : > { %2321 = vmatprep.subr.bf16.mxu1 %v3464_v37 }
 0x144   : > { %v1209_v0 = vpop.f32.mrf.mxu1  ;;  %2281 = vmatpush1.bf16.msra.mxu0 %v3459_v38 }
 0x145   : > { %2322 = vmatpush1.bf16.msra.mxu1 %v3462_v39  ;;  %2282 = vmatprep.subr.bf16.mxu0 %v3467_v40 }
 0x146   : > { %v1211_v45 = vpop.f32.mrf.mxu1  ;;  %2323 = vmatprep.subr.bf16.mxu1 %v3470_v41 }
 0x148   : > { %v1213_v48 = vpop.f32.mrf.mxu1  ;;  %2283 = vmatpush1.bf16.msra.mxu0 %v3465_v43 }
 0x149   : > { %2324 = vmatpush1.bf16.msra.mxu1 %v3468_v44  ;;  %2284 = vmatprep.subr.bf16.mxu0 %v3473_v46 }
 0x14a   : > { %v1214_v51 = vpop.f32.mrf.mxu1  ;;  %2325 = vmatprep.subr.bf16.mxu1 %v3476_v47 }
 0x14c   : > { %2285 = vmatpush1.bf16.msra.mxu0 %v3471_v49 }
 0x14d   : > { %2326 = vmatpush1.bf16.msra.mxu1 %v3474_v50  ;;  %2286 = vmatprep.subr.bf16.mxu0 %v3479_v27 }
 0x14e   : > { %2327 = vmatprep.subr.bf16.mxu1 %v3482_v52 }
 0x150   : > { %2287 = vmatpush1.bf16.msra.mxu0 %v3477_v53 }
 0x151   : > { %2328 = vmatpush1.bf16.msra.mxu1 %v3480_v54  ;;  %2959 = vmatprep.subr.msk.bf16.mxu0 %vm2259_vm4, %v3483_v55 }
 0x152   : > { %2961 = vmatprep.subr.msk.bf16.mxu1 %vm2259_vm4, %v3485_v56 }
 0x153   : > { %v1168_v61 = vpop.f32.mrf.mxu0 }
 0x154   : > { %v1210_v63 = vadd.f32 %v1209_v0, %v1168_v61  ;;  %2303 = vmatpush2.bf16.msra.mxu0 %v2261_v59 }
 0x155   : > { %2344 = vmatpush2.bf16.msra.mxu1 %v2267_v60  ;;  %v1170_v1 = vpop.f32.mrf.mxu0  ;;  %2984 = vmatprep.subr.bf16.mxu0 %v3489_v7 }
 0x156   : > { %v1212_v2 = vadd.f32 %v1211_v45, %v1170_v1 }
 0x157   : > { %v1172_v3 = vpop.f32.mrf.mxu0  ;;  %2305 = vmatmul.mubr.bf16.vlgmr.msra.gmra.mxu0 %v2076_v62 }
 0x158   : > { %2346 = vmatmul.mubr.bf16.vlgmr.msra.gmra.mxu1 %v2076_v62  ;;  %2985 = vmatpush3.bf16.msra.mxu0 %v3490_v8 }
 0x159   : > { %v1173_v6 = vpop.f32.mrf.mxu0  ;;  %2986 = vmatprep.subr.bf16.mxu0 %v3491_v19 }
 0x15c   : > { %2987 = vmatpush3.bf16.msra.mxu0 %v3492_v20 }
 0x15d   : > { %2988 = vmatprep.subr.bf16.mxu0 %v3493_v21 }
 0x160   : > { %2989 = vmatpush3.bf16.msra.mxu0 %v3494_v22 }
 0x161   : > { %2990 = vmatprep.subr.bf16.mxu0 %v3495_v23 }
 0x164   : > { %2991 = vmatpush3.bf16.msra.mxu0 %v3496_v24 }
 0x165   : > { %2992 = vmatprep.subr.bf16.mxu0 %v3497_v42 }
 0x168   : > { %2993 = vmatpush3.bf16.msra.mxu0 %v3498_v25 }
 0x169   : > { %2994 = vmatprep.subr.bf16.mxu0 %v3499_v26 }
 0x16c   : > { %2995 = vmatpush3.bf16.msra.mxu0 %v3500_v29 }
 0x16d   : > { %2996 = vmatprep.subr.bf16.mxu0 %v3501_v31 }
 0x170   : > { %2997 = vmatpush3.bf16.msra.mxu0 %v3502_v32 }
 0x171   : > { %2998 = vmatprep.subr.bf16.mxu0 %v3503_v34 }
 0x174   : > { %2999 = vmatpush3.bf16.msra.mxu0 %v3504_v35 }
 0x183   : > { %v1291_v10 = vpop.f32.mrf.mxu0 }
 0x184   : > { %v1250_v9 = vpop.f32.mrf.mxu1 }
 0x185   : > { %v1292_v11 = vadd.f32 %v1291_v10, %v1250_v9  ;;  %v1293_v13 = vpop.f32.mrf.mxu0 }
 0x186   : > { %v1252_v12 = vpop.f32.mrf.mxu1 }
 0x187   : > { %v1294_v14 = vadd.f32 %v1293_v13, %v1252_v12  ;;  %v1295_v16 = vpop.f32.mrf.mxu0 }
 0x188   : > { %v1254_v15 = vpop.f32.mrf.mxu1 }
 0x189   : > { %v1296_v33 = vpop.f32.mrf.mxu0 }
 0x18a   : > { %v1255_v18 = vpop.f32.mrf.mxu1 }
 0x1b4   : > { %v1951_v28 = vpop.f32.mrf.mxu1 }
 0x1b6   : > { %v1953_v4 = vpop.f32.mrf.mxu1 }
 0x1b8   : > { %v1955_v36 = vpop.f32.mrf.mxu1 }
 0x1ba   : > { %v1956_v17 = vpop.f32.mrf.mxu1 }
 0x1c3   : > { %v1910_v30 = vpop.f32.mrf.mxu0 }
 0x1c4   : > { %v1911_v5 = vadd.f32 %v1910_v30, %v1210_v63 }
 0x1c5   : > { %v1912_v37 = vpop.f32.mrf.mxu0 }
 0x1c6   : > { %v1913_v38 = vadd.f32 %v1912_v37, %v1212_v2  ;;  %v1952_v39 = vadd.f32 %v1951_v28, %v1911_v5 }
 0x1c7   : > { %v1914_v40 = vpop.f32.mrf.mxu0 }
 0x1c8   : > { %v1954_v41 = vadd.f32 %v1953_v4, %v1913_v38 }
 0x1c9   : > { %v1915_v0 = vpop.f32.mrf.mxu0 }
 0x1f3   : > { %v2033_v44 = vpop.f32.mrf.mxu0 }
 0x1f4   : > { %v1992_v43 = vpop.f32.mrf.mxu1 }
 0x1f5   : > { %v2035_v46 = vpop.f32.mrf.mxu0  ;;  %v1993_v51 = vadd.f32 %v1992_v43, %v1292_v11 }
 0x1f6   : > { %v1994_v45 = vpop.f32.mrf.mxu1 }
 0x1f7   : > { %v2037_v48 = vpop.f32.mrf.mxu0  ;;  %v1995_v27 = vadd.f32 %v1994_v45, %v1294_v14  ;;  %v2034_v52 = vadd.f32 %v2033_v44, %v1993_v51 }
 0x1f8   : > { %v1996_v47 = vpop.f32.mrf.mxu1 }
 0x1f9   : > { %v2038_v50 = vpop.f32.mrf.mxu0  ;;  %v2036_v55 = vadd.f32 %v2035_v46, %v1995_v27 }
 0x1fa   : > { %v1997_v49 = vpop.f32.mrf.mxu1 }
 0x217   : > { %v2306_v53 = vpop.f32.mrf.mxu0 }
 0x218   : > { %v2347_v54 = vpop.f32.mrf.mxu1  ;;  %v2354_v56 = vadd.f32 %v2306_v53, %v1952_v39 }
 0x219   : > { %v2356_v57 = vadd.f32 %v2347_v54, %v2034_v52  ;;  %v2308_v58 = vpop.f32.mrf.mxu0 }
 0x21a   : > { %v2349_v59 = vpop.f32.mrf.mxu1  ;;  %v2358_v60 = vmul.f32 %v2354_v56, %v2354_v56  ;;  %v2355_v62 = vadd.f32 %v2308_v58, %v1954_v41 }
 0x21b   : > { %v2360_v61 = vmul.f32 %v2356_v57, %v2356_v57  ;;  %v2357_v63 = vadd.f32 %v2349_v59, %v2036_v55  ;;  %v2310_v1 = vpop.f32.mrf.mxu0 }
 0x21c   : > { %v2351_v2 = vpop.f32.mrf.mxu1  ;;  %v2359_v6 = vmul.f32 %v2355_v62, %v2355_v62 }
 0x21d   : > { %v2362_v3 = vadd.f32 %v2360_v61, %v2358_v60  ;;  %v2361_v7 = vmul.f32 %v2357_v63, %v2357_v63  ;;  %v2311_v8 = vpop.f32.mrf.mxu0 }
 0x21e   : > { %v2352_v9 = vpop.f32.mrf.mxu1 }
 0x21f   : > { %3505 = vrsqrt.f32 %v2362_v3  ;;  %v2363_v10 = vadd.f32 %v2361_v7, %v2359_v6  ;;  %vm2366_vm5 = vcmp.eq.f32.partialorder %v2362_v3, inf  ;;  %v2369_v16 = vand.u32 2147483648, %v2362_v3 }
 0x220   : > { %vm2368_vm7 = vcmp.eq.f32.partialorder %v2362_v3, 0.0 }
 0x221   : > { %3507 = vrsqrt.f32 %v2363_v10  ;;  %vm2373_vm6 = vcmp.eq.f32.partialorder %v2363_v10, inf  ;;  %v2376_v18 = vand.u32 2147483648, %v2363_v10  ;;  %vm2375_vm8 = vcmp.eq.f32.partialorder %v2363_v10, 0.0 }
 0x22c   : > { %v3506_v11 = vpop.eup %3505 }
 0x22d   : > { %v2365_v12 = vmul.f32 %v3506_v11, %v2362_v3 }
 0x22e   : > { %v3508_v13 = vpop.eup %3507 }
 0x22f   : > { %v2372_v14 = vmul.f32 %v3508_v13, %v2363_v10  ;;  %v2367_v15 = vsel %vm2366_vm5, %v2362_v3, %v2365_v12 }
 0x230   : > { %v2370_v19 = vsel %vm2368_vm7, %v2369_v16, %v2367_v15 }
 0x231   : > { %v2374_v33 = vsel %vm2373_vm6, %v2363_v10, %v2372_v14  ;;  %v2378_v22 = vpack.c.bf16 %v2370_v19, %v2370_v19 }
 0x232   : > { %v2377_v20 = vsel %vm2375_vm8, %v2376_v18, %v2374_v33 }
 0x233   : > { %v2379_v21 = vpack.c.bf16 %v2377_v20, %v2377_v20 }
 0x235   : > { %2540 = vmatprep.mubr.bf16.mxu0 %v2379_v21 }
 0x236   : > { %2541 = vmatmul.mubr.bf16.vlgmr.msra.gmra.mxu0 %v2378_v22 }
 0x2f6   : > { %v3000_v23 = vpop.f32.mrf.mxu0 }
 0x2f8   : > { %v3001_v24 = vpop.f32.mrf.mxu0 }
 0x2f9   : > { %v3002_v42 = vadd.f32 %v3001_v24, %v3000_v23 }
 0x2fa   : > { %v3003_v25 = vpop.f32.mrf.mxu0 }
 0x2fb   : > { %v2548_v26 = vadd.f32 1.0, %v3002_v42  ;;  %v2551_v31 = vmul.f32 -0.5, %v3002_v42  ;;  %v2554_v34 = vand.u32 2147483647, %v3002_v42 }
 0x2fc   : > { %v3004_v29 = vpop.f32.mrf.mxu0 }
 0x2fd   : > { %3509 = vlog2.f32 %v2548_v26  ;;  %v2552_v32 = vadd.f32 1.0, %v2551_v31  ;;  %vm2555_vm9 = vcmp.lt.f32.partialorder %v2554_v34, 0.0004427343 }
 0x2ff   : > { %v2553_v28 = vmul.f32 %v3002_v42, %v2552_v32 }
 0x30a   : > { %v3510_v35 = vpop.eup %3509 }
 0x30b   : > { %v2550_v4 = vmul.f32 0.6931472, %v3510_v35 }
 0x30d   : > { %v2556_v36 = vsel %vm2555_vm9, %v2553_v28, %v2550_v4 }
 0x30e   : > { %2557 = vst [vmem:[%s276_s9] sm:$0xff] %v2556_v36 }
 0x30f   : > { %3628 = shalt.err (!%p3625_p8)
}
 0x310   : > { %s3629_s8 = scalar_lea.hbm %s3922_s16, 128  ;;  %s3633_s25 = scalar_lea.hbm %s3962_s5, 256 }
 0x311   : > { %p3630_p13 = scmp.ne.s32.totalorder %s3922_s16, %s3629_s8  ;;  %p3634_p6 = scmp.lt.s32.totalorder %s3922_s16, %s3962_s5 }
 0x312   : > { %p3635_p12 = scmp.lt.s32.totalorder %s3633_s25, %s3629_s8 }
 0x313   : > { %p3631_p11 = pnand %p3630_p13, %p3975_p1 }
 0x314   : > { %p3636_p10 = por %p3635_p12, %p3634_p6 }
 0x315   : > { %p3632_p0 = pneg %p3631_p11 }
 0x317   : > { %p3637_p9 = pnand %p3636_p10, %p3632_p0 }
 0x319   : > { %3640 = shalt.err (!%p3637_p9)
}
 0x31a   : > { %3022 = dma.vmem_to_hbm [thread:$0]  (%p3975_p1), %s2573_s10, 128, %s3922_s16, %s2559_s17  }
 0x31b PF: > { %p3049_p3 = scmp.ge.s32.totalorder %s3687_s21, 2  ;;  %s2584_s7 = sand.u32 1, %s3675_s18  }
 0x31c   : > { %p3976_p2 = scmp.ne.s32.totalorder %s3966_s29, 0  ;;  %s2585_s9 = scalar_lea.sflag [#allocation4], %s2584_s7 }
 0x31e   : > { %p3038_p4 = pnand %p3049_p3, %p3976_p2 }
 0x320   : > { %p3039_p5 = pneg %p3038_p4 }
 0x322   : > { %3670 = dma.done.wait (%p3039_p5), %s2585_s9, 128  }
 0x323   : > { %3672 = vsyncadd (%p3039_p5), %s2585_s9, 4294967168  ;;  %p18_p7 = scmp.ge.s32.totalorder %s3754_s24, 4   ;;  %s3977_s18 = smov %s3679_s19 }
 0x324   : > { %s3978_s19 = smov %s3683_s20  ;;  %s3979_s20 = smov %s3765_s27 }
 0x325   : > { %s3980_s21 = smov %s3754_s24  ;;  %20 = sbr.rel (!%p18_p7) target bundleno = 6 (0x6), region = 92 }
 0x32a   :  { %2590 = vsyncpa [#allocation3], 1 }
 0x32b   :  { %2592 = vsyncpa [#allocation3 + $0x1], 1 }
 0x32c   :  { %2593 = vsyncpa [#allocation6], 1 }
 0x32d   :  { %2594 = vsyncpa [#allocation9], 1 }
 0x32e   :  { %2595 = vsyncpa [#allocation4], 1 }
 0x32f   :  { %2597 = vsyncpa [#allocation4 + $0x1], 1 }

</bundles_post_ra>
